<compile_context>
chip_gen: v5e
topology: v5e:2x2
jax: 0.10.0
libtpu: 0.0.40
codegen_flags: <defaults>
</compile_context>

<pallas_src>
import functools
import math

import jax
import jax.numpy as jnp
from jax import lax
from jax.experimental import pallas as pl
from jax.experimental.pallas import tpu as pltpu


def _round_up(x, m):
    return (x + m - 1) // m * m


def _rnn_block_kernel(contrib_ref, hid0_ref, w1h_ref, w2_ref, b2_ref,
                      out_ref, hid_out_ref, *, tb, t_real):
    """One grid step = TB recurrent timesteps (unrolled)."""
    blk = pl.program_id(0)

    # Seed the resident carry (hid_out_ref doubles as the recurrent state).
    @pl.when(blk == 0)
    def _():
        hid_out_ref[...] = hid0_ref[...]

    # Hoist loop-invariant loads / broadcasts out of the unrolled time loop
    # (JAX does not CSE broadcast_in_dim).
    w1h = w1h_ref[...]                                             # (Hp, Hp+Op)
    w2 = w2_ref[...]                                               # (Hp+Op, Op)
    b2 = jnp.broadcast_to(b2_ref[...], (out_ref.shape[1], out_ref.shape[2]))
    Hp = hid_out_ref.shape[1]
    need_tail_mask = (t_real % tb) != 0

    def step(i, hidden):
        # Stage 1 (recurrent part only): category projection + b1 precomputed
        # in the wrapper; columns of `fused` are [hidden_new (Hp) | out1 (Op)].
        fused = contrib_ref[i] + jnp.dot(hidden, w1h,
                                         preferred_element_type=jnp.float32)
        hidden_new = fused[:, :Hp]

        # Stage 2: o2o.  cat([hidden_new, out1]) is exactly `fused`.
        # Pad lanes carry -1e30 baked into b2 -> implicitly masked log-softmax.
        out2 = jnp.dot(fused, w2, preferred_element_type=jnp.float32) + b2

        # dropout(p=0.1) in eval mode == identity.
        m = jnp.max(out2, axis=1, keepdims=True)
        shifted = out2 - m
        lse = jnp.log(jnp.sum(jnp.exp(shifted), axis=1, keepdims=True))
        out_ref[i] = (shifted - lse).astype(out_ref.dtype)

        if need_tail_mask:
            g = blk * tb + i
            hidden_new = jnp.where(g < t_real, hidden_new, hidden)
        return hidden_new

    hid_out_ref[...] = lax.fori_loop(0, tb, step, hid_out_ref[...], unroll=True)


def init_params(key, n_categories, hidden_size, output_size):
    """PyTorch-Linear-equivalent parameters, stored as (in_features, out_features)."""
    def linear(k, fan_in, fan_out):
        kw, kb = jax.random.split(k)
        bound = 1.0 / math.sqrt(fan_in)
        w = jax.random.uniform(kw, (fan_in, fan_out), jnp.float32, -bound, bound)
        b = jax.random.uniform(kb, (fan_out,), jnp.float32, -bound, bound)
        return w, b

    k1, k2, k3 = jax.random.split(key, 3)
    w_i2h, b_i2h = linear(k1, n_categories + hidden_size, hidden_size)
    w_i2o, b_i2o = linear(k2, n_categories + hidden_size, output_size)
    w_o2o, b_o2o = linear(k3, hidden_size + output_size, output_size)
    return {"w_i2h": w_i2h, "b_i2h": b_i2h,
            "w_i2o": w_i2o, "b_i2o": b_i2o,
            "w_o2o": w_o2o, "b_o2o": b_o2o}


def pack_params(params):
    """Fuse i2h/i2o into one packed weight, pad H/O to 128 lanes, bake softmax mask."""
    w_i2h, b_i2h = params["w_i2h"], params["b_i2h"]
    w_i2o, b_i2o = params["w_i2o"], params["b_i2o"]
    w_o2o, b_o2o = params["w_o2o"], params["b_o2o"]

    H = w_i2h.shape[1]
    O = w_i2o.shape[1]
    n_cat = w_i2h.shape[0] - H
    Hp = _round_up(H, 128)
    Op = _round_up(O, 128)

    # Stage-1 packed weight, columns laid out as [hidden (Hp) | output (Op)].
    w1 = jnp.zeros((n_cat + H, Hp + Op), jnp.float32)
    w1 = w1.at[:, :H].set(w_i2h).at[:, Hp:Hp + O].set(w_i2o)
    b1 = jnp.zeros((1, Hp + Op), jnp.float32)
    b1 = b1.at[0, :H].set(b_i2h).at[0, Hp:Hp + O].set(b_i2o)
    w1_c = w1[:n_cat]                                               # (n_cat, Hp+Op)
    w1_h = jnp.zeros((Hp, Hp + Op), jnp.float32).at[:H].set(w1[n_cat:])

    # Stage-2 (o2o) weight, rows matching the stage-1 column layout, cols padded.
    w2 = jnp.zeros((Hp + Op, Op), jnp.float32)
    w2 = w2.at[:H, :O].set(w_o2o[:H]).at[Hp:Hp + O, :O].set(w_o2o[H:])
    # Softmax padding mask baked into the bias: pad lanes get -1e30 (finite, no NaNs).
    b2 = jnp.full((1, Op), -1e30, jnp.float32).at[0, :O].set(b_o2o)

    return {"w1_c": w1_c, "w1_h": w1_h, "b1": b1, "w2": w2, "b2": b2,
            "H": H, "O": O, "Hp": Hp, "Op": Op, "n_cat": n_cat}


def rnn_hidden_category_3_scan(category_seq, hidden0, packed, *, time_block=8):
    """Run T recurrent steps inside one pallas_call (time axis tiled by TB).

    category_seq: (T, B, n_categories); hidden0: (B, H).
    Returns (log_softmax outputs (T, B, O), final hidden (B, H)).
    """
    T, B, n_cat = category_seq.shape
    H, O, Hp, Op = packed["H"], packed["O"], packed["Hp"], packed["Op"]
    Bp = _round_up(max(B, 8), 8)
    TB = max(1, min(time_block, T))
    Tp = _round_up(T, TB)
    n_blocks = Tp // TB

    cat_p = jnp.zeros((Tp, Bp, n_cat), jnp.float32).at[:T, :B, :].set(category_seq)
    hid_p = jnp.zeros((Bp, Hp), jnp.float32).at[:B, :H].set(hidden0)

    # Hoist the non-recurrent half of stage 1 out of the serial scan: one batched
    # (Tp*Bp, n_cat) @ (n_cat, Hp+Op) matmul, bias folded in, done by XLA.
    contrib = (cat_p.reshape(Tp * Bp, n_cat) @ packed["w1_c"]
               + packed["b1"]).reshape(Tp, Bp, Hp + Op)

    kernel = functools.partial(_rnn_block_kernel, tb=TB, t_real=T)

    out_seq, hid_fin = pl.pallas_call(
        kernel,
        grid=(n_blocks,),
        in_specs=[
            pl.BlockSpec((TB, Bp, Hp + Op), lambda t: (t, 0, 0)),   # per-block cat contrib
            pl.BlockSpec((Bp, Hp), lambda t: (0, 0)),               # initial hidden (resident)
            pl.BlockSpec((Hp, Hp + Op), lambda t: (0, 0)),          # recurrent stage-1 weight
            pl.BlockSpec((Hp + Op, Op), lambda t: (0, 0)),          # stage-2 (o2o) weight
            pl.BlockSpec((1, Op), lambda t: (0, 0)),                # o2o bias (+ baked mask)
        ],
        out_specs=(
            pl.BlockSpec((TB, Bp, Op), lambda t: (t, 0, 0)),        # per-block log-probs
            pl.BlockSpec((Bp, Hp), lambda t: (0, 0)),               # final hidden (= carry)
        ),
        out_shape=(
            jax.ShapeDtypeStruct((Tp, Bp, Op), jnp.float32),
            jax.ShapeDtypeStruct((Bp, Hp), jnp.float32),
        ),
        compiler_params=pltpu.CompilerParams(
            dimension_semantics=("arbitrary",),                     # sequential recurrence
            vmem_limit_bytes=32 * 1024 * 1024,
        ),
    )(contrib, hid_p, packed["w1_h"], packed["w2"], packed["b2"])

    return out_seq[:T, :B, :O], hid_fin[:B, :H]


def rnn_hidden_category_3_forward(category, input_unused, hidden, packed):
    """Single-step forward matching the PyTorch module signature: (out, hidden_new)."""
    del input_unused  # unused in the original forward pass
    out_seq, hid_new = rnn_hidden_category_3_scan(category[None], hidden, packed,
                                                  time_block=1)
    return out_seq[0], hid_new


def reference_step(category, hidden, params):
    """Pure-JAX reference of one module forward step."""
    ic = jnp.concatenate([category, hidden], axis=1)
    hidden_new = ic @ params["w_i2h"] + params["b_i2h"]
    out1 = ic @ params["w_i2o"] + params["b_i2o"]
    oc = jnp.concatenate([hidden_new, out1], axis=1)
    out2 = oc @ params["w_o2o"] + params["b_o2o"]
    return jax.nn.log_softmax(out2, axis=1), hidden_new


if __name__ == "__main__":
    # Small shapes consistent with the module's forward:
    #   category: (B, n_categories), input: (B, input_size) [unused], hidden: (B, H).
    # T=32 steps, tiled TB=8 per grid step -> grid=(4,) inside one pallas_call.
    B, n_categories, input_size, hidden_size, output_size, T = 8, 4, 8, 32, 16, 32

    key = jax.random.PRNGKey(0)
    kp, kc, ki = jax.random.split(key, 3)
    params = init_params(kp, n_categories, hidden_size, output_size)
    packed = pack_params(params)

    category_seq = jax.random.normal(kc, (T, B, n_categories), jnp.float32)
    input_seq = jax.random.normal(ki, (T, B, input_size), jnp.float32)  # unused, as in PyTorch
    hidden0 = jnp.zeros((B, hidden_size), jnp.float32)

    # Fused multi-step kernel.
    out_seq, hid_fin = rnn_hidden_category_3_scan(category_seq, hidden0, packed, time_block=8)
    out_seq = jax.block_until_ready(out_seq)
    hid_fin = jax.block_until_ready(hid_fin)

    # Pure-JAX reference: apply the module forward step by step.
    ref_h = hidden0
    ref_outs = []
    for t in range(T):
        o, ref_h = reference_step(category_seq[t], ref_h, params)
        ref_outs.append(o)
    ref_out_seq = jnp.stack(ref_outs)

    assert out_seq.shape == (T, B, output_size)
    assert hid_fin.shape == (B, hidden_size)
    assert jnp.allclose(out_seq, ref_out_seq, atol=1e-4), "log-softmax sequence mismatch"
    assert jnp.allclose(hid_fin, ref_h, atol=1e-4), "final hidden mismatch"

    # Single-step API (mirrors the PyTorch module forward exactly).
    out1, hid1 = rnn_hidden_category_3_forward(category_seq[0], input_seq[0], hidden0, packed)
    out1 = jax.block_until_ready(out1)
    ref_o1, ref_h1 = reference_step(category_seq[0], hidden0, params)
    assert jnp.allclose(out1, ref_o1, atol=1e-4), "single-step output mismatch"
    assert jnp.allclose(hid1, ref_h1, atol=1e-4), "single-step hidden mismatch"

    print("KERNEL_OK")
</pallas_src>

<mosaic_0001>
module attributes {stable_mosaic.version = 11 : i64} {
  func.func @_rnn_block_kernel(%arg0: i32, %arg1: memref<8x8x256xf32, #tpu.memory_space<vmem>>, %arg2: memref<8x128xf32, #tpu.memory_space<vmem>>, %arg3: memref<128x256xf32, #tpu.memory_space<vmem>>, %arg4: memref<256x128xf32, #tpu.memory_space<vmem>>, %arg5: memref<1x128xf32, #tpu.memory_space<vmem>>, %arg6: memref<8x8x128xf32, #tpu.memory_space<vmem>>, %arg7: memref<8x128xf32, #tpu.memory_space<vmem>>) attributes {dimension_semantics = [#tpu.dimension_semantics<arbitrary>], iteration_bounds = array<i64: 4>, scalar_prefetch = 0 : i64, scratch_operands = 0 : i64, tpu.core_type = #tpu.core_type<tc>, window_params = [{transform_indices = @transform_0, window_bounds = array<i64: 8, 8, 256>}, {pipeline_mode = #tpu.pipeline_mode<synchronous>, transform_indices = @transform_1, window_bounds = array<i64: 8, 128>}, {pipeline_mode = #tpu.pipeline_mode<synchronous>, transform_indices = @transform_2, window_bounds = array<i64: 128, 256>}, {pipeline_mode = #tpu.pipeline_mode<synchronous>, transform_indices = @transform_3, window_bounds = array<i64: 256, 128>}, {pipeline_mode = #tpu.pipeline_mode<synchronous>, transform_indices = @transform_4, window_bounds = array<i64: 1, 128>}, {transform_indices = @transform_5, window_bounds = array<i64: 8, 8, 128>}, {pipeline_mode = #tpu.pipeline_mode<synchronous>, transform_indices = @transform_6, window_bounds = array<i64: 8, 128>}]} {
    %c0_i32 = arith.constant 0 : i32
    %0 = arith.cmpi eq, %arg0, %c0_i32 : i32
    %1 = arith.extui %0 : i1 to i32
    %c0_i32_0 = arith.constant 0 : i32
    %2 = arith.cmpi ne, %1, %c0_i32_0 : i32
    scf.if %2 {
      %c0_74 = arith.constant 0 : index
      %c0_75 = arith.constant 0 : index
      %186 = vector.load %arg2[%c0_74, %c0_75] : memref<8x128xf32, #tpu.memory_space<vmem>>, vector<8x128xf32>
      %c0_76 = arith.constant 0 : index
      %c0_77 = arith.constant 0 : index
      %187 = vector.load %arg7[%c0_76, %c0_77] : memref<8x128xf32, #tpu.memory_space<vmem>>, vector<8x128xf32>
      tpu.vector_store %arg7[%c0_76, %c0_77], %186 {strides = array<i32>} : memref<8x128xf32, #tpu.memory_space<vmem>>, vector<8x128xf32>,
    } else {
    }
    %c0 = arith.constant 0 : index
    %c0_1 = arith.constant 0 : index
    %3 = vector.load %arg3[%c0, %c0_1] : memref<128x256xf32, #tpu.memory_space<vmem>>, vector<128x256xf32>
    %c0_2 = arith.constant 0 : index
    %c0_3 = arith.constant 0 : index
    %4 = vector.load %arg4[%c0_2, %c0_3] : memref<256x128xf32, #tpu.memory_space<vmem>>, vector<256x128xf32>
    %c0_4 = arith.constant 0 : index
    %c0_5 = arith.constant 0 : index
    %5 = vector.load %arg5[%c0_4, %c0_5] : memref<1x128xf32, #tpu.memory_space<vmem>>, vector<1x128xf32>
    %6 = vector.shape_cast %5 : vector<1x128xf32> to vector<1x128xf32>
    %7 = vector.broadcast %6 : vector<1x128xf32> to vector<8x128xf32>
    %c0_6 = arith.constant 0 : index
    %c0_7 = arith.constant 0 : index
    %8 = vector.load %arg7[%c0_6, %c0_7] : memref<8x128xf32, #tpu.memory_space<vmem>>, vector<8x128xf32>
    %c0_i32_8 = arith.constant 0 : i32
    %9 = arith.index_cast %c0_i32_8 : i32 to index
    %c0_9 = arith.constant 0 : index
    %c0_10 = arith.constant 0 : index
    %10 = vector.load %arg1[%9, %c0_9, %c0_10] : memref<8x8x256xf32, #tpu.memory_space<vmem>>, vector<1x8x256xf32>
    %11 = vector.shape_cast %10 : vector<1x8x256xf32> to vector<8x256xf32>
    %cst = arith.constant dense<0.000000e+00> : vector<8x256xf32>
    %12 = tpu.matmul %8, %3, %cst {dimension_numbers = #tpu.dot_dimension_numbers<[1], [0], [0], [1], [0, 0, 1, 1], [], []>} : vector<8x128xf32>, vector<128x256xf32>, vector<8x256xf32> -> vector<8x256xf32>
    %13 = arith.addf %11, %12 : vector<8x256xf32>
    %14 = vector.extract_strided_slice %13 {offsets = [0, 0], sizes = [8, 128], strides = [1, 1]} : vector<8x256xf32> to vector<8x128xf32>
    %cst_11 = arith.constant dense<0.000000e+00> : vector<8x128xf32>
    %15 = tpu.matmul %13, %4, %cst_11 {dimension_numbers = #tpu.dot_dimension_numbers<[1], [0], [0], [1], [0, 0, 1, 1], [], []>} : vector<8x256xf32>, vector<256x128xf32>, vector<8x128xf32> -> vector<8x128xf32>
    %16 = arith.addf %15, %7 : vector<8x128xf32>
    %cst_12 = arith.constant dense<0xFF800000> : vector<8xf32>
    %17 = vector.multi_reduction <maximumf>, %16, %cst_12 [1] : vector<8x128xf32> to vector<8xf32>
    %18 = vector.shape_cast %17 : vector<8xf32> to vector<8x1xf32>
    %19 = vector.broadcast %18 : vector<8x1xf32> to vector<8x128xf32>
    %20 = arith.subf %16, %19 : vector<8x128xf32>
    %21 = math.exp %20 : vector<8x128xf32>
    %cst_13 = arith.constant dense<0.000000e+00> : vector<8xf32>
    %22 = vector.multi_reduction <add>, %21, %cst_13 [1] : vector<8x128xf32> to vector<8xf32>
    %23 = vector.shape_cast %22 : vector<8xf32> to vector<8x1xf32>
    %24 = math.log %23 : vector<8x1xf32>
    %25 = vector.broadcast %24 : vector<8x1xf32> to vector<8x128xf32>
    %26 = arith.subf %20, %25 : vector<8x128xf32>
    %27 = arith.index_cast %c0_i32_8 : i32 to index
    %c0_14 = arith.constant 0 : index
    %c0_15 = arith.constant 0 : index
    %28 = vector.load %arg6[%27, %c0_14, %c0_15] : memref<8x8x128xf32, #tpu.memory_space<vmem>>, vector<1x8x128xf32>
    %29 = vector.shape_cast %28 : vector<1x8x128xf32> to vector<8x128xf32>
    %30 = vector.shape_cast %26 : vector<8x128xf32> to vector<1x8x128xf32>
    tpu.vector_store %arg6[%27, %c0_14, %c0_15], %30 {strides = array<i32>} : memref<8x8x128xf32, #tpu.memory_space<vmem>>, vector<1x8x128xf32>,
    %c1_i32 = arith.constant 1 : i32
    %31 = arith.index_cast %c1_i32 : i32 to index
    %c0_16 = arith.constant 0 : index
    %c0_17 = arith.constant 0 : index
    %32 = vector.load %arg1[%31, %c0_16, %c0_17] : memref<8x8x256xf32, #tpu.memory_space<vmem>>, vector<1x8x256xf32>
    %33 = vector.shape_cast %32 : vector<1x8x256xf32> to vector<8x256xf32>
    %cst_18 = arith.constant dense<0.000000e+00> : vector<8x256xf32>
    %34 = tpu.matmul %14, %3, %cst_18 {dimension_numbers = #tpu.dot_dimension_numbers<[1], [0], [0], [1], [0, 0, 1, 1], [], []>} : vector<8x128xf32>, vector<128x256xf32>, vector<8x256xf32> -> vector<8x256xf32>
    %35 = arith.addf %33, %34 : vector<8x256xf32>
    %36 = vector.extract_strided_slice %35 {offsets = [0, 0], sizes = [8, 128], strides = [1, 1]} : vector<8x256xf32> to vector<8x128xf32>
    %cst_19 = arith.constant dense<0.000000e+00> : vector<8x128xf32>
    %37 = tpu.matmul %35, %4, %cst_19 {dimension_numbers = #tpu.dot_dimension_numbers<[1], [0], [0], [1], [0, 0, 1, 1], [], []>} : vector<8x256xf32>, vector<256x128xf32>, vector<8x128xf32> -> vector<8x128xf32>
    %38 = arith.addf %37, %7 : vector<8x128xf32>
    %cst_20 = arith.constant dense<0xFF800000> : vector<8xf32>
    %39 = vector.multi_reduction <maximumf>, %38, %cst_20 [1] : vector<8x128xf32> to vector<8xf32>
    %40 = vector.shape_cast %39 : vector<8xf32> to vector<8x1xf32>
    %41 = vector.broadcast %40 : vector<8x1xf32> to vector<8x128xf32>
    %42 = arith.subf %38, %41 : vector<8x128xf32>
    %43 = math.exp %42 : vector<8x128xf32>
    %cst_21 = arith.constant dense<0.000000e+00> : vector<8xf32>
    %44 = vector.multi_reduction <add>, %43, %cst_21 [1] : vector<8x128xf32> to vector<8xf32>
    %45 = vector.shape_cast %44 : vector<8xf32> to vector<8x1xf32>
    %46 = math.log %45 : vector<8x1xf32>
    %47 = vector.broadcast %46 : vector<8x1xf32> to vector<8x128xf32>
    %48 = arith.subf %42, %47 : vector<8x128xf32>
    %49 = arith.index_cast %c1_i32 : i32 to index
    %c0_22 = arith.constant 0 : index
    %c0_23 = arith.constant 0 : index
    %50 = vector.load %arg6[%49, %c0_22, %c0_23] : memref<8x8x128xf32, #tpu.memory_space<vmem>>, vector<1x8x128xf32>
    %51 = vector.shape_cast %50 : vector<1x8x128xf32> to vector<8x128xf32>
    %52 = vector.shape_cast %48 : vector<8x128xf32> to vector<1x8x128xf32>
    tpu.vector_store %arg6[%49, %c0_22, %c0_23], %52 {strides = array<i32>} : memref<8x8x128xf32, #tpu.memory_space<vmem>>, vector<1x8x128xf32>,
    %c2_i32 = arith.constant 2 : i32
    %53 = arith.index_cast %c2_i32 : i32 to index
    %c0_24 = arith.constant 0 : index
    %c0_25 = arith.constant 0 : index
    %54 = vector.load %arg1[%53, %c0_24, %c0_25] : memref<8x8x256xf32, #tpu.memory_space<vmem>>, vector<1x8x256xf32>
    %55 = vector.shape_cast %54 : vector<1x8x256xf32> to vector<8x256xf32>
    %cst_26 = arith.constant dense<0.000000e+00> : vector<8x256xf32>
    %56 = tpu.matmul %36, %3, %cst_26 {dimension_numbers = #tpu.dot_dimension_numbers<[1], [0], [0], [1], [0, 0, 1, 1], [], []>} : vector<8x128xf32>, vector<128x256xf32>, vector<8x256xf32> -> vector<8x256xf32>
    %57 = arith.addf %55, %56 : vector<8x256xf32>
    %58 = vector.extract_strided_slice %57 {offsets = [0, 0], sizes = [8, 128], strides = [1, 1]} : vector<8x256xf32> to vector<8x128xf32>
    %cst_27 = arith.constant dense<0.000000e+00> : vector<8x128xf32>
    %59 = tpu.matmul %57, %4, %cst_27 {dimension_numbers = #tpu.dot_dimension_numbers<[1], [0], [0], [1], [0, 0, 1, 1], [], []>} : vector<8x256xf32>, vector<256x128xf32>, vector<8x128xf32> -> vector<8x128xf32>
    %60 = arith.addf %59, %7 : vector<8x128xf32>
    %cst_28 = arith.constant dense<0xFF800000> : vector<8xf32>
    %61 = vector.multi_reduction <maximumf>, %60, %cst_28 [1] : vector<8x128xf32> to vector<8xf32>
    %62 = vector.shape_cast %61 : vector<8xf32> to vector<8x1xf32>
    %63 = vector.broadcast %62 : vector<8x1xf32> to vector<8x128xf32>
    %64 = arith.subf %60, %63 : vector<8x128xf32>
    %65 = math.exp %64 : vector<8x128xf32>
    %cst_29 = arith.constant dense<0.000000e+00> : vector<8xf32>
    %66 = vector.multi_reduction <add>, %65, %cst_29 [1] : vector<8x128xf32> to vector<8xf32>
    %67 = vector.shape_cast %66 : vector<8xf32> to vector<8x1xf32>
    %68 = math.log %67 : vector<8x1xf32>
    %69 = vector.broadcast %68 : vector<8x1xf32> to vector<8x128xf32>
    %70 = arith.subf %64, %69 : vector<8x128xf32>
    %71 = arith.index_cast %c2_i32 : i32 to index
    %c0_30 = arith.constant 0 : index
    %c0_31 = arith.constant 0 : index
    %72 = vector.load %arg6[%71, %c0_30, %c0_31] : memref<8x8x128xf32, #tpu.memory_space<vmem>>, vector<1x8x128xf32>
    %73 = vector.shape_cast %72 : vector<1x8x128xf32> to vector<8x128xf32>
    %74 = vector.shape_cast %70 : vector<8x128xf32> to vector<1x8x128xf32>
    tpu.vector_store %arg6[%71, %c0_30, %c0_31], %74 {strides = array<i32>} : memref<8x8x128xf32, #tpu.memory_space<vmem>>, vector<1x8x128xf32>,
    %c3_i32 = arith.constant 3 : i32
    %75 = arith.index_cast %c3_i32 : i32 to index
    %c0_32 = arith.constant 0 : index
    %c0_33 = arith.constant 0 : index
    %76 = vector.load %arg1[%75, %c0_32, %c0_33] : memref<8x8x256xf32, #tpu.memory_space<vmem>>, vector<1x8x256xf32>
    %77 = vector.shape_cast %76 : vector<1x8x256xf32> to vector<8x256xf32>
    %cst_34 = arith.constant dense<0.000000e+00> : vector<8x256xf32>
    %78 = tpu.matmul %58, %3, %cst_34 {dimension_numbers = #tpu.dot_dimension_numbers<[1], [0], [0], [1], [0, 0, 1, 1], [], []>} : vector<8x128xf32>, vector<128x256xf32>, vector<8x256xf32> -> vector<8x256xf32>
    %79 = arith.addf %77, %78 : vector<8x256xf32>
    %80 = vector.extract_strided_slice %79 {offsets = [0, 0], sizes = [8, 128], strides = [1, 1]} : vector<8x256xf32> to vector<8x128xf32>
    %cst_35 = arith.constant dense<0.000000e+00> : vector<8x128xf32>
    %81 = tpu.matmul %79, %4, %cst_35 {dimension_numbers = #tpu.dot_dimension_numbers<[1], [0], [0], [1], [0, 0, 1, 1], [], []>} : vector<8x256xf32>, vector<256x128xf32>, vector<8x128xf32> -> vector<8x128xf32>
    %82 = arith.addf %81, %7 : vector<8x128xf32>
    %cst_36 = arith.constant dense<0xFF800000> : vector<8xf32>
    %83 = vector.multi_reduction <maximumf>, %82, %cst_36 [1] : vector<8x128xf32> to vector<8xf32>
    %84 = vector.shape_cast %83 : vector<8xf32> to vector<8x1xf32>
    %85 = vector.broadcast %84 : vector<8x1xf32> to vector<8x128xf32>
    %86 = arith.subf %82, %85 : vector<8x128xf32>
    %87 = math.exp %86 : vector<8x128xf32>
    %cst_37 = arith.constant dense<0.000000e+00> : vector<8xf32>
    %88 = vector.multi_reduction <add>, %87, %cst_37 [1] : vector<8x128xf32> to vector<8xf32>
    %89 = vector.shape_cast %88 : vector<8xf32> to vector<8x1xf32>
    %90 = math.log %89 : vector<8x1xf32>
    %91 = vector.broadcast %90 : vector<8x1xf32> to vector<8x128xf32>
    %92 = arith.subf %86, %91 : vector<8x128xf32>
    %93 = arith.index_cast %c3_i32 : i32 to index
    %c0_38 = arith.constant 0 : index
    %c0_39 = arith.constant 0 : index
    %94 = vector.load %arg6[%93, %c0_38, %c0_39] : memref<8x8x128xf32, #tpu.memory_space<vmem>>, vector<1x8x128xf32>
    %95 = vector.shape_cast %94 : vector<1x8x128xf32> to vector<8x128xf32>
    %96 = vector.shape_cast %92 : vector<8x128xf32> to vector<1x8x128xf32>
    tpu.vector_store %arg6[%93, %c0_38, %c0_39], %96 {strides = array<i32>} : memref<8x8x128xf32, #tpu.memory_space<vmem>>, vector<1x8x128xf32>,
    %c4_i32 = arith.constant 4 : i32
    %97 = arith.index_cast %c4_i32 : i32 to index
    %c0_40 = arith.constant 0 : index
    %c0_41 = arith.constant 0 : index
    %98 = vector.load %arg1[%97, %c0_40, %c0_41] : memref<8x8x256xf32, #tpu.memory_space<vmem>>, vector<1x8x256xf32>
    %99 = vector.shape_cast %98 : vector<1x8x256xf32> to vector<8x256xf32>
    %cst_42 = arith.constant dense<0.000000e+00> : vector<8x256xf32>
    %100 = tpu.matmul %80, %3, %cst_42 {dimension_numbers = #tpu.dot_dimension_numbers<[1], [0], [0], [1], [0, 0, 1, 1], [], []>} : vector<8x128xf32>, vector<128x256xf32>, vector<8x256xf32> -> vector<8x256xf32>
    %101 = arith.addf %99, %100 : vector<8x256xf32>
    %102 = vector.extract_strided_slice %101 {offsets = [0, 0], sizes = [8, 128], strides = [1, 1]} : vector<8x256xf32> to vector<8x128xf32>
    %cst_43 = arith.constant dense<0.000000e+00> : vector<8x128xf32>
    %103 = tpu.matmul %101, %4, %cst_43 {dimension_numbers = #tpu.dot_dimension_numbers<[1], [0], [0], [1], [0, 0, 1, 1], [], []>} : vector<8x256xf32>, vector<256x128xf32>, vector<8x128xf32> -> vector<8x128xf32>
    %104 = arith.addf %103, %7 : vector<8x128xf32>
    %cst_44 = arith.constant dense<0xFF800000> : vector<8xf32>
    %105 = vector.multi_reduction <maximumf>, %104, %cst_44 [1] : vector<8x128xf32> to vector<8xf32>
    %106 = vector.shape_cast %105 : vector<8xf32> to vector<8x1xf32>
    %107 = vector.broadcast %106 : vector<8x1xf32> to vector<8x128xf32>
    %108 = arith.subf %104, %107 : vector<8x128xf32>
    %109 = math.exp %108 : vector<8x128xf32>
    %cst_45 = arith.constant dense<0.000000e+00> : vector<8xf32>
    %110 = vector.multi_reduction <add>, %109, %cst_45 [1] : vector<8x128xf32> to vector<8xf32>
    %111 = vector.shape_cast %110 : vector<8xf32> to vector<8x1xf32>
    %112 = math.log %111 : vector<8x1xf32>
    %113 = vector.broadcast %112 : vector<8x1xf32> to vector<8x128xf32>
    %114 = arith.subf %108, %113 : vector<8x128xf32>
    %115 = arith.index_cast %c4_i32 : i32 to index
    %c0_46 = arith.constant 0 : index
    %c0_47 = arith.constant 0 : index
    %116 = vector.load %arg6[%115, %c0_46, %c0_47] : memref<8x8x128xf32, #tpu.memory_space<vmem>>, vector<1x8x128xf32>
    %117 = vector.shape_cast %116 : vector<1x8x128xf32> to vector<8x128xf32>
    %118 = vector.shape_cast %114 : vector<8x128xf32> to vector<1x8x128xf32>
    tpu.vector_store %arg6[%115, %c0_46, %c0_47], %118 {strides = array<i32>} : memref<8x8x128xf32, #tpu.memory_space<vmem>>, vector<1x8x128xf32>,
    %c5_i32 = arith.constant 5 : i32
    %119 = arith.index_cast %c5_i32 : i32 to index
    %c0_48 = arith.constant 0 : index
    %c0_49 = arith.constant 0 : index
    %120 = vector.load %arg1[%119, %c0_48, %c0_49] : memref<8x8x256xf32, #tpu.memory_space<vmem>>, vector<1x8x256xf32>
    %121 = vector.shape_cast %120 : vector<1x8x256xf32> to vector<8x256xf32>
    %cst_50 = arith.constant dense<0.000000e+00> : vector<8x256xf32>
    %122 = tpu.matmul %102, %3, %cst_50 {dimension_numbers = #tpu.dot_dimension_numbers<[1], [0], [0], [1], [0, 0, 1, 1], [], []>} : vector<8x128xf32>, vector<128x256xf32>, vector<8x256xf32> -> vector<8x256xf32>
    %123 = arith.addf %121, %122 : vector<8x256xf32>
    %124 = vector.extract_strided_slice %123 {offsets = [0, 0], sizes = [8, 128], strides = [1, 1]} : vector<8x256xf32> to vector<8x128xf32>
    %cst_51 = arith.constant dense<0.000000e+00> : vector<8x128xf32>
    %125 = tpu.matmul %123, %4, %cst_51 {dimension_numbers = #tpu.dot_dimension_numbers<[1], [0], [0], [1], [0, 0, 1, 1], [], []>} : vector<8x256xf32>, vector<256x128xf32>, vector<8x128xf32> -> vector<8x128xf32>
    %126 = arith.addf %125, %7 : vector<8x128xf32>
    %cst_52 = arith.constant dense<0xFF800000> : vector<8xf32>
    %127 = vector.multi_reduction <maximumf>, %126, %cst_52 [1] : vector<8x128xf32> to vector<8xf32>
    %128 = vector.shape_cast %127 : vector<8xf32> to vector<8x1xf32>
    %129 = vector.broadcast %128 : vector<8x1xf32> to vector<8x128xf32>
    %130 = arith.subf %126, %129 : vector<8x128xf32>
    %131 = math.exp %130 : vector<8x128xf32>
    %cst_53 = arith.constant dense<0.000000e+00> : vector<8xf32>
    %132 = vector.multi_reduction <add>, %131, %cst_53 [1] : vector<8x128xf32> to vector<8xf32>
    %133 = vector.shape_cast %132 : vector<8xf32> to vector<8x1xf32>
    %134 = math.log %133 : vector<8x1xf32>
    %135 = vector.broadcast %134 : vector<8x1xf32> to vector<8x128xf32>
    %136 = arith.subf %130, %135 : vector<8x128xf32>
    %137 = arith.index_cast %c5_i32 : i32 to index
    %c0_54 = arith.constant 0 : index
    %c0_55 = arith.constant 0 : index
    %138 = vector.load %arg6[%137, %c0_54, %c0_55] : memref<8x8x128xf32, #tpu.memory_space<vmem>>, vector<1x8x128xf32>
    %139 = vector.shape_cast %138 : vector<1x8x128xf32> to vector<8x128xf32>
    %140 = vector.shape_cast %136 : vector<8x128xf32> to vector<1x8x128xf32>
    tpu.vector_store %arg6[%137, %c0_54, %c0_55], %140 {strides = array<i32>} : memref<8x8x128xf32, #tpu.memory_space<vmem>>, vector<1x8x128xf32>,
    %c6_i32 = arith.constant 6 : i32
    %141 = arith.index_cast %c6_i32 : i32 to index
    %c0_56 = arith.constant 0 : index
    %c0_57 = arith.constant 0 : index
    %142 = vector.load %arg1[%141, %c0_56, %c0_57] : memref<8x8x256xf32, #tpu.memory_space<vmem>>, vector<1x8x256xf32>
    %143 = vector.shape_cast %142 : vector<1x8x256xf32> to vector<8x256xf32>
    %cst_58 = arith.constant dense<0.000000e+00> : vector<8x256xf32>
    %144 = tpu.matmul %124, %3, %cst_58 {dimension_numbers = #tpu.dot_dimension_numbers<[1], [0], [0], [1], [0, 0, 1, 1], [], []>} : vector<8x128xf32>, vector<128x256xf32>, vector<8x256xf32> -> vector<8x256xf32>
    %145 = arith.addf %143, %144 : vector<8x256xf32>
    %146 = vector.extract_strided_slice %145 {offsets = [0, 0], sizes = [8, 128], strides = [1, 1]} : vector<8x256xf32> to vector<8x128xf32>
    %cst_59 = arith.constant dense<0.000000e+00> : vector<8x128xf32>
    %147 = tpu.matmul %145, %4, %cst_59 {dimension_numbers = #tpu.dot_dimension_numbers<[1], [0], [0], [1], [0, 0, 1, 1], [], []>} : vector<8x256xf32>, vector<256x128xf32>, vector<8x128xf32> -> vector<8x128xf32>
    %148 = arith.addf %147, %7 : vector<8x128xf32>
    %cst_60 = arith.constant dense<0xFF800000> : vector<8xf32>
    %149 = vector.multi_reduction <maximumf>, %148, %cst_60 [1] : vector<8x128xf32> to vector<8xf32>
    %150 = vector.shape_cast %149 : vector<8xf32> to vector<8x1xf32>
    %151 = vector.broadcast %150 : vector<8x1xf32> to vector<8x128xf32>
    %152 = arith.subf %148, %151 : vector<8x128xf32>
    %153 = math.exp %152 : vector<8x128xf32>
    %cst_61 = arith.constant dense<0.000000e+00> : vector<8xf32>
    %154 = vector.multi_reduction <add>, %153, %cst_61 [1] : vector<8x128xf32> to vector<8xf32>
    %155 = vector.shape_cast %154 : vector<8xf32> to vector<8x1xf32>
    %156 = math.log %155 : vector<8x1xf32>
    %157 = vector.broadcast %156 : vector<8x1xf32> to vector<8x128xf32>
    %158 = arith.subf %152, %157 : vector<8x128xf32>
    %159 = arith.index_cast %c6_i32 : i32 to index
    %c0_62 = arith.constant 0 : index
    %c0_63 = arith.constant 0 : index
    %160 = vector.load %arg6[%159, %c0_62, %c0_63] : memref<8x8x128xf32, #tpu.memory_space<vmem>>, vector<1x8x128xf32>
    %161 = vector.shape_cast %160 : vector<1x8x128xf32> to vector<8x128xf32>
    %162 = vector.shape_cast %158 : vector<8x128xf32> to vector<1x8x128xf32>
    tpu.vector_store %arg6[%159, %c0_62, %c0_63], %162 {strides = array<i32>} : memref<8x8x128xf32, #tpu.memory_space<vmem>>, vector<1x8x128xf32>,
    %c7_i32 = arith.constant 7 : i32
    %163 = arith.index_cast %c7_i32 : i32 to index
    %c0_64 = arith.constant 0 : index
    %c0_65 = arith.constant 0 : index
    %164 = vector.load %arg1[%163, %c0_64, %c0_65] : memref<8x8x256xf32, #tpu.memory_space<vmem>>, vector<1x8x256xf32>
    %165 = vector.shape_cast %164 : vector<1x8x256xf32> to vector<8x256xf32>
    %cst_66 = arith.constant dense<0.000000e+00> : vector<8x256xf32>
    %166 = tpu.matmul %146, %3, %cst_66 {dimension_numbers = #tpu.dot_dimension_numbers<[1], [0], [0], [1], [0, 0, 1, 1], [], []>} : vector<8x128xf32>, vector<128x256xf32>, vector<8x256xf32> -> vector<8x256xf32>
    %167 = arith.addf %165, %166 : vector<8x256xf32>
    %168 = vector.extract_strided_slice %167 {offsets = [0, 0], sizes = [8, 128], strides = [1, 1]} : vector<8x256xf32> to vector<8x128xf32>
    %cst_67 = arith.constant dense<0.000000e+00> : vector<8x128xf32>
    %169 = tpu.matmul %167, %4, %cst_67 {dimension_numbers = #tpu.dot_dimension_numbers<[1], [0], [0], [1], [0, 0, 1, 1], [], []>} : vector<8x256xf32>, vector<256x128xf32>, vector<8x128xf32> -> vector<8x128xf32>
    %170 = arith.addf %169, %7 : vector<8x128xf32>
    %cst_68 = arith.constant dense<0xFF800000> : vector<8xf32>
    %171 = vector.multi_reduction <maximumf>, %170, %cst_68 [1] : vector<8x128xf32> to vector<8xf32>
    %172 = vector.shape_cast %171 : vector<8xf32> to vector<8x1xf32>
    %173 = vector.broadcast %172 : vector<8x1xf32> to vector<8x128xf32>
    %174 = arith.subf %170, %173 : vector<8x128xf32>
    %175 = math.exp %174 : vector<8x128xf32>
    %cst_69 = arith.constant dense<0.000000e+00> : vector<8xf32>
    %176 = vector.multi_reduction <add>, %175, %cst_69 [1] : vector<8x128xf32> to vector<8xf32>
    %177 = vector.shape_cast %176 : vector<8xf32> to vector<8x1xf32>
    %178 = math.log %177 : vector<8x1xf32>
    %179 = vector.broadcast %178 : vector<8x1xf32> to vector<8x128xf32>
    %180 = arith.subf %174, %179 : vector<8x128xf32>
    %181 = arith.index_cast %c7_i32 : i32 to index
    %c0_70 = arith.constant 0 : index
    %c0_71 = arith.constant 0 : index
    %182 = vector.load %arg6[%181, %c0_70, %c0_71] : memref<8x8x128xf32, #tpu.memory_space<vmem>>, vector<1x8x128xf32>
    %183 = vector.shape_cast %182 : vector<1x8x128xf32> to vector<8x128xf32>
    %184 = vector.shape_cast %180 : vector<8x128xf32> to vector<1x8x128xf32>
    tpu.vector_store %arg6[%181, %c0_70, %c0_71], %184 {strides = array<i32>} : memref<8x8x128xf32, #tpu.memory_space<vmem>>, vector<1x8x128xf32>,
    %c8_i32 = arith.constant 8 : i32
    %c0_72 = arith.constant 0 : index
    %c0_73 = arith.constant 0 : index
    %185 = vector.load %arg7[%c0_72, %c0_73] : memref<8x128xf32, #tpu.memory_space<vmem>>, vector<8x128xf32>
    tpu.vector_store %arg7[%c0_72, %c0_73], %168 {strides = array<i32>} : memref<8x128xf32, #tpu.memory_space<vmem>>, vector<8x128xf32>,
    return
  }
  func.func @transform_0(%arg0: i32) -> (i32, i32, i32) {
    %c0_i32 = arith.constant 0 : i32
    %c0_i32_0 = arith.constant 0 : i32
    %c0_i32_1 = arith.constant 0 : i32
    return %arg0, %c0_i32, %c0_i32_0 : i32, i32, i32
  }
  func.func @transform_1(%arg0: i32) -> (i32, i32) {
    %c0_i32 = arith.constant 0 : i32
    %c0_i32_0 = arith.constant 0 : i32
    %c0_i32_1 = arith.constant 0 : i32
    return %c0_i32, %c0_i32_0 : i32, i32
  }
  func.func @transform_2(%arg0: i32) -> (i32, i32) {
    %c0_i32 = arith.constant 0 : i32
    %c0_i32_0 = arith.constant 0 : i32
    %c0_i32_1 = arith.constant 0 : i32
    return %c0_i32, %c0_i32_0 : i32, i32
  }
  func.func @transform_3(%arg0: i32) -> (i32, i32) {
    %c0_i32 = arith.constant 0 : i32
    %c0_i32_0 = arith.constant 0 : i32
    %c0_i32_1 = arith.constant 0 : i32
    return %c0_i32, %c0_i32_0 : i32, i32
  }
  func.func @transform_4(%arg0: i32) -> (i32, i32) {
    %c0_i32 = arith.constant 0 : i32
    %c0_i32_0 = arith.constant 0 : i32
    %c0_i32_1 = arith.constant 0 : i32
    return %c0_i32, %c0_i32_0 : i32, i32
  }
  func.func @transform_5(%arg0: i32) -> (i32, i32, i32) {
    %c0_i32 = arith.constant 0 : i32
    %c0_i32_0 = arith.constant 0 : i32
    %c0_i32_1 = arith.constant 0 : i32
    return %arg0, %c0_i32, %c0_i32_0 : i32, i32, i32
  }
  func.func @transform_6(%arg0: i32) -> (i32, i32) {
    %c0_i32 = arith.constant 0 : i32
    %c0_i32_0 = arith.constant 0 : i32
    %c0_i32_1 = arith.constant 0 : i32
    return %c0_i32, %c0_i32_0 : i32, i32
  }
}

</mosaic_0001>

<bundles_post_ra>
// kernel: tpu_custom_call.1
= control target key start
LH: loop header
LB: loop body
LE: loop exit
PB: predicated region body
PF: predicated region fallthrough
CT: control target
= control target key end

     0   :  { %12 = vsyncpa [#allocation3], 0  ;;  %s2678_s0 = inlined_call_operand.hbm [shape: f32[32,8,256], index: 0, kind: input, shape index: {}]   ;;  %s2679_s1 = inlined_call_operand.hbm [shape: f32[8,128], index: 1, kind: input, shape index: {}]   ;;  %s2680_s2 = inlined_call_operand.hbm [shape: f32[128,256], index: 2, kind: input, shape index: {}]   ;;  %s2681_s3 = inlined_call_operand.hbm [shape: f32[256,128], index: 3, kind: input, shape index: {}]   ;;  %s2682_s4 = inlined_call_operand.vmem [shape: f32[1,128], index: 4, kind: input, shape index: {}]   ;;  %s2683_s5 = inlined_call_operand.hbm [shape: f32[32,8,128], index: 5, kind: output, shape index: {0}]   ;;  %s2684_s6 = inlined_call_operand.hbm [shape: f32[8,128], index: 6, kind: output, shape index: {1}]  }
   0x1   :  { %14 = vsyncpa [#allocation3 + $0x1], 0 }
   0x2   :  { %15 = vsyncpa [#allocation6], 0 }
   0x3   :  { %16 = vsyncpa [#allocation9], 0 }
   0x4   :  { %17 = vsyncpa [#allocation4], 0 }
   0x5   :  { %19 = vsyncpa [#allocation4 + $0x1], 0 }
   0x6   :  { %20 = vsyncpa [#allocation12], 0  ;;  %s1817_s21 = smov 0   ;;  %s1819_s22 = smov 0  }
   0x7   :  { %s1821_s23 = smov 0   ;;  %s1823_s24 = smov 0  }
   0x8 LB: > { %s1838_s25 = sadd.s32 4294967295, %s1770_s24   ;;  %s1314_s26 = sadd.s32 4294967294, %s1770_s24   ;;  %s1770_s24 = sphi %s1823_s24, %s2777_s24   ;;  %s1766_s23 = sphi %s1821_s23, %s2776_s23   ;;  %s1762_s22 = sphi %s1819_s22, %s2775_s22   ;;  %s1758_s21 = sphi %s1817_s21, %s2774_s21  }
   0x9   : > { %p46_p0 = scmp.ne.s32.totalorder %s1762_s22, %s1758_s21  ;;  %p47_p1 = scmp.eq.s32.totalorder %s1838_s25, 0 }
   0xa   : > { %p2687_p2 = scmp.eq.s32.totalorder %s1838_s25, 3  ;;  %p160_p3 = scmp.eq.s32.totalorder %s1314_s26, 3 }
   0xb   : > { %p1847_p4 = por %p47_p1, %p46_p0  ;;  %p1315_p5 = scmp.ge.s32.totalorder %s1770_s24, 1 }
   0xc   : > { %p1852_p6 = por %p160_p3, %p46_p0  ;;  %p188_p7 = scmp.lt.s32.totalorder %s1770_s24, 5 }
   0xd   : > { %s200_s7 = sshll.u32 %s2679_s1, 4  ;;  %s1772_s9 = smov [#allocation5]   ;;  %s201_s7 = int_to_ptr.hbm [resolvable:$true] %s200_s7 }
   0xe   : > { %p1861_p9 = pnand %p1315_p5, %p188_p7  ;;  %s202_s10 = sshll.u32 %s1772_s9, 4  ;;  %s203_s10 = int_to_ptr.vmem [resolvable:$true] %s202_s10 }
   0xf   : > { %s211_s13 = sshll.u32 %s2680_s2, 4  ;;  %s1773_s15 = smov [#allocation7]   ;;  %s212_s13 = int_to_ptr.hbm [resolvable:$true] %s211_s13 }
  0x10   : > { %p1382_p10 = pneg %p1861_p9  ;;  %s213_s16 = sshll.u32 %s1773_s15, 4  ;;  %s214_s16 = int_to_ptr.vmem [resolvable:$true] %s213_s16 }
  0x11   : > { %s2685_s17 = smov 256   ;;  %s2686_s18 = smov 16  }
  0x12   : > { %p1872_p11 = pnand %p1382_p10, %p47_p1  ;;  %s225_s26 = sshll.u32 %s2681_s3, 4  ;;  %s226_s26 = int_to_ptr.hbm [resolvable:$true] %s225_s26 }
  0x13   : > { %s1776_s29 = smov [#allocation8]   ;;  %s1778_s9 = smov 8  }
  0x14   : > { %1385 = dma.hbm_to_vmem [thread:$0]  (!%p1872_p11), %s201_s7, 128, %s203_s10, [#allocation6]  }
  0x15   : > { %1388 = dma.hbm_to_vmem [thread:$0]  (!%p1872_p11), %s212_s13, 4096, %s214_s16, [#allocation6], %s2685_s17, %s2685_s17, %s2686_s18  }
  0x16   : > { %s227_s30 = sshll.u32 %s1776_s29, 4  ;;  %s1777_s7 = smov 128   ;;  %s228_s30 = int_to_ptr.vmem [resolvable:$true] %s227_s30 }
  0x17   : > { %1391 = dma.hbm_to_vmem [thread:$0]  (!%p1872_p11), %s226_s26, 4096, %s228_s30, [#allocation9], %s1777_s7, %s1777_s7, %s1778_s9  }
  0x18   : > { %s1889_s10 = sadd.s32 1, %s1770_s24   ;;  %s33_s12 = sadd.s32 1, %s1766_s23 }
  0x19   : > { %s30_s11 = ssub.s32 %s1770_s24, %s1889_s10  ;;  %p40_p13 = scmp.ne.s32.totalorder %s1766_s23, %s1762_s22 }
  0x1a   : > { %p31_p12 = scmp.eq.s32.totalorder %s30_s11, 0  ;;  %p41_p0 = scmp.eq.s32.totalorder %s1770_s24, 0 }
  0x1b   : > { %p1902_p3 = por %p2687_p2, %p40_p13  ;;  %p1403_p5 = scmp.lt.s32.totalorder %s1770_s24, 4 }
  0x1c   : > { %s1898_s13 = scalar_select %p31_p12, %s1766_s23, %s33_s12  }
  0x1d   : > { %s244_s16 = sand.u32 1, %s1766_s23   ;;  %s1360_s19 = sshll.u32 %s1770_s24, 7 }
  0x1e   : > { %p42_p7 = por %p41_p0, %p40_p13  ;;  %s1320_s14 = sshll.u32 %s244_s16, 7 }
  0x1f   : > { %s254_s29 = scalar_lea.hbm %s2678_s0, %s1360_s19  ;;  %s248_s7 = scalar_lea.vmem [#allocation2], %s1320_s14 }
  0x20   : > { %s255_s30 = sshll.u32 %s254_s29, 4  ;;  %s257_s9 = sshll.u32 %s248_s7, 4  ;;  %s256_s30 = int_to_ptr.hbm [resolvable:$true] %s255_s30  ;;  %s258_s9 = int_to_ptr.vmem [resolvable:$true] %s257_s9 }
  0x21   : > { %p1912_p10 = pnand %p1403_p5, %p42_p7  ;;  %s245_s12 = scalar_lea.sflag [#allocation3], %s244_s16 }
  0x22   : > { %s1634_s17 = sshra.s32 %s256_s30, 4  ;;  %s1641_s14 = scalar_lea.hbm %s2678_s0, 512  ;;  %s1635_s17 = int_to_ptr.hbm [resolvable:$true] %s1634_s17 }
  0x23   : > { %s1636_s18 = scalar_lea.hbm %s1635_s17, 128  ;;  %p1638_p12 = pneg %p1912_p10 }
  0x24   : > { %p1637_p11 = scmp.ne.s32.totalorder %s1635_s17, %s1636_s18  ;;  %p1642_p5 = scmp.lt.s32.totalorder %s1635_s17, %s2678_s0 }
  0x25   : > { %p1643_p7 = scmp.lt.s32.totalorder %s1641_s14, %s1636_s18 }
  0x26   : > { %p1639_p13 = pnand %p1638_p12, %p1637_p11 }
  0x27   : > { %p1644_p2 = por %p1643_p7, %p1642_p5 }
  0x28   : > { %p1640_p0 = pneg %p1639_p13 }
  0x2a   : > { %p1645_p8 = pnand %p1644_p2, %p1640_p0 }
  0x2c   : > { %1648 = shalt.err (!%p1645_p8)
}
  0x2d   : > { %s2720_s16 = smov 16   ;;  %s2721_s7 = smov 256  }
  0x2e   : > { %1395 = dma.hbm_to_vmem [thread:$0]  (!%p1912_p10), %s256_s30, 2048, %s258_s9, %s245_s12, %s2721_s7, %s2721_s7, %s2720_s16  }
  0x2f   : > { %269 = sbr.rel (%p1861_p9) target bundleno = 1524 (0x5f4), region = 40 }
  0x34   : > { %s1932_s19 = sand.u32 1, %s1762_s22  }
  0x35   : > { %s1325_s17 = sshll.u32 %s1932_s19, 7  ;;  %s272_s18 = scalar_lea.sflag [#allocation3], %s1932_s19 }
  0x36   : > { %s1936_s20 = scalar_lea.vmem [#allocation2], %s1325_s17 }
  0x37   : > { %1737 = dma.done.wait (%p1847_p4), %s272_s18, 2048  }
  0x38   : > { %1739 = vsyncadd (%p1847_p4), %s272_s18, 4294965248 }
  0x39   : > { %1741 = dma.done.wait (%p47_p1), [#allocation6], 4224  }
  0x3a   : > { %1743 = vsyncadd (%p47_p1), [#allocation6], 4294963072 }
  0x3b   : > { %1745 = dma.done.wait (%p47_p1), [#allocation9], 4096  }
  0x3c   : > { %1747 = vsyncadd (%p47_p1), [#allocation9], 4294963200  ;;  %s1329_s8 = sshll.u32 %s1932_s19, 6  ;;  %p2722_p2 = scmp.ne.s32.totalorder %s1838_s25, 0 }
  0x3d   : > { %s1951_s30 = scalar_lea.vmem [#allocation10], %s1329_s8 }
  0x3e   : > { %325 = sbr.rel (%p2722_p2) target bundleno = 69 (0x45), region = 60 }
  0x43   : > { %v326_v0 = vld [vmem:[#allocation5] sm:$0xff] }
  0x44   : > { %327 = vst [vmem:[#allocation11] sm:$0xff] %v326_v0 }
  0x45 PF: > { %v1955_v1 = vld [vmem:[#allocation7 + $0xf0] sm:$0xff]  ;;  %v1957_v2 = vld [vmem:[#allocation7 + $0xe0] sm:$0xff]  ;;  %v1959_v3 = vld [vmem:[#allocation7 + $0xf8] sm:$0xff]  ;;  %s1779_s11 = smov [#allocation11]   ;;  %s1202_s29 = sshll.u32 %s2684_s6, 4  ;;  %s1203_s29 = int_to_ptr.hbm [resolvable:$true] %s1202_s29 }
  0x46   : > { %399 = vmatpush.msra.mxu0 %v1955_v1  ;;  %419 = vmatpush.msra.mxu1 %v1959_v3  ;;  %v1963_v4 = vld [vmem:[#allocation7 + $0xe8] sm:$0xff]  ;;  %v1965_v5 = vld [vmem:[#allocation7 + $0xd0] sm:$0xff]  ;;  %v1967_v6 = vld [vmem:[#allocation7 + $0xd8] sm:$0xff]  ;;  %s1200_s12 = sshll.u32 %s1779_s11, 4  ;;  %p2771_p1 = scmp.eq.s32.totalorder %s1838_s25, 3  ;;  %s1201_s12 = int_to_ptr.vmem [resolvable:$true] %s1200_s12 }
  0x47   : > { %v1971_v7 = vld [vmem:[#allocation7 + $0xc0] sm:$0xff]  ;;  %v1973_v8 = vld [vmem:[#allocation7 + $0xc8] sm:$0xff]  ;;  %v1977_v9 = vld [vmem:[#allocation7 + $0xb0] sm:$0xff]  ;;  %s1361_s16 = sshll.u32 %s1838_s25, 6  ;;  %s1173_s27 = scalar_lea.sflag [#allocation4], %s1932_s19 }
  0x48   : > { %400 = vmatpush.msra.mxu0 %v1957_v2  ;;  %420 = vmatpush.msra.mxu1 %v1963_v4  ;;  %v1979_v10 = vld [vmem:[#allocation7 + $0xb8] sm:$0xff]  ;;  %v1983_v11 = vld [vmem:[#allocation7 + $0xa0] sm:$0xff]  ;;  %v1985_v12 = vld [vmem:[#allocation7 + $0xa8] sm:$0xff]  ;;  %s1184_s18 = scalar_lea.hbm %s2683_s5, %s1361_s16  ;;  %s1712_s26 = scalar_lea.hbm %s2683_s5, 256 }
  0x49   : > { %v1989_v13 = vld [vmem:[#allocation7 + $0x90] sm:$0xff]  ;;  %v1991_v14 = vld [vmem:[#allocation7 + $0x98] sm:$0xff]  ;;  %v2001_v18 = vld [vmem:[#allocation7 + $0x80] sm:$0xff]  ;;  %s1187_s8 = sshll.u32 %s1184_s18, 4  ;;  %s1188_s8 = int_to_ptr.hbm [resolvable:$true] %s1187_s8 }
  0x4a   : > { %401 = vmatpush.msra.mxu0 %v1965_v5  ;;  %421 = vmatpush.msra.mxu1 %v1967_v6  ;;  %v1995_v15 = vld [vmem:[#allocation8 + $0x78] sm:$0xff]  ;;  %v1997_v16 = vld [vmem:[#allocation8 + $0x70] sm:$0xff]  ;;  %v2003_v19 = vld [vmem:[#allocation7 + $0x88] sm:$0xff]  ;;  %s1706_s9 = sshra.s32 %s1188_s8, 4  ;;  %s1707_s9 = int_to_ptr.hbm [resolvable:$true] %s1706_s9 }
  0x4b   : > { %v1999_v17 = vld [vmem:[#allocation8 + $0xf8] sm:$0xff]  ;;  %441 = vmatpush.msra.mxu2 %v1995_v15  ;;  %v2007_v20 = vld [vmem:[#allocation8 + $0xf0] sm:$0xff]  ;;  %v2011_v21 = vld [vmem:[#allocation8 + $0x68] sm:$0xff]  ;;  %s1708_s11 = scalar_lea.hbm %s1707_s9, 64  ;;  %p1713_p10 = scmp.lt.s32.totalorder %s1707_s9, %s2683_s5 }
  0x4c   : > { %402 = vmatpush.msra.mxu0 %v1971_v7  ;;  %422 = vmatpush.msra.mxu1 %v1973_v8  ;;  %v2013_v22 = vld [vmem:[#allocation8 + $0xe8] sm:$0xff]  ;;  %v2015_v23 = vld [vmem:[#allocation7 + $0x70] sm:$0xff]  ;;  %v2017_v24 = vld [vmem:[#allocation7 + $0x78] sm:$0xff]  ;;  %p1709_p4 = scmp.ne.s32.totalorder %s1707_s9, %s1708_s11  ;;  %p1714_p11 = scmp.lt.s32.totalorder %s1712_s26, %s1708_s11 }
  0x4d   : > { %461 = vmatpush.msra.mxu3 %v1999_v17  ;;  %442 = vmatpush.msra.mxu2 %v1997_v16  ;;  %v2023_v25 = vld [vmem:[#allocation8 + $0x60] sm:$0xff]  ;;  %v2029_v28 = vld [vmem:[#allocation7 + $0x68] sm:$0xff]  ;;  %v2035_v29 = vld [vmem:[#allocation8 + $0x58] sm:$0xff] }
  0x4e   : > { %403 = vmatpush.msra.mxu0 %v1977_v9  ;;  %423 = vmatpush.msra.mxu1 %v1979_v10  ;;  %v2025_v26 = vld [vmem:[#allocation8 + $0xe0] sm:$0xff]  ;;  %v2037_v30 = vld [vmem:[#allocation8 + $0xd8] sm:$0xff]  ;;  %v2039_v31 = vld [vmem:[#allocation7 + $0x50] sm:$0xff]  ;;  %p1710_p8 = pnand %p1709_p4, %p1902_p3  ;;  %p1715_p12 = por %p1714_p11, %p1713_p10 }
  0x4f   : > { %462 = vmatpush.msra.mxu3 %v2007_v20  ;;  %v2027_v27 = vld [vmem:[#allocation7 + $0x60] sm:$0xff]  ;;  %443 = vmatpush.msra.mxu2 %v2011_v21  ;;  %v2041_v32 = vld [vmem:[#allocation7 + $0x58] sm:$0xff]  ;;  %v2047_v33 = vld [vmem:[#allocation8 + $0x50] sm:$0xff] }
  0x50   : > { %404 = vmatpush.msra.mxu0 %v1983_v11  ;;  %424 = vmatpush.msra.mxu1 %v1985_v12  ;;  %v2049_v34 = vld [vmem:[#allocation8 + $0xd0] sm:$0xff]  ;;  %v2051_v35 = vld [vmem:[#allocation7 + $0x40] sm:$0xff]  ;;  %v2053_v36 = vld [vmem:[#allocation7 + $0x48] sm:$0xff]  ;;  %p1711_p9 = pneg %p1710_p8 }
  0x51   : > { %463 = vmatpush.msra.mxu3 %v2013_v22  ;;  %444 = vmatpush.msra.mxu2 %v2023_v25  ;;  %v2059_v37 = vld [vmem:[#allocation8 + $0x48] sm:$0xff]  ;;  %v2063_v39 = vld [vmem:[#allocation7 + $0x30] sm:$0xff]  ;;  %v2065_v40 = vld [vmem:[#allocation7 + $0x38] sm:$0xff] }
  0x52   : > { %405 = vmatpush.msra.mxu0 %v1989_v13  ;;  %425 = vmatpush.msra.mxu1 %v1991_v14  ;;  %v2061_v38 = vld [vmem:[#allocation8 + $0xc8] sm:$0xff]  ;;  %2723 = vst [vmem:[#allocation18_spill] sm:$0xff] %v2063_v39  ;;  %v2071_v41 = vld [vmem:[#allocation8 + $0x40] sm:$0xff]  ;;  %v2083_v45 = vld [vmem:[#allocation8 + $0x38] sm:$0xff]  ;;  %p1716_p13 = pnand %p1715_p12, %p1711_p9 }
  0x53   : > { %464 = vmatpush.msra.mxu3 %v2025_v26  ;;  %445 = vmatpush.msra.mxu2 %v2035_v29  ;;  %2724 = vst [vmem:[#allocation19_spill] sm:$0xff] %v2065_v40  ;;  %v2073_v42 = vld [vmem:[#allocation8 + $0xc0] sm:$0xff]  ;;  %v2077_v44 = vld [vmem:[#allocation7 + $0x28] sm:$0xff]  ;;  %v2085_v46 = vld [vmem:[#allocation8 + $0xb8] sm:$0xff] }
  0x54   : > { %406 = vmatpush.msra.mxu0 %v2001_v18  ;;  %426 = vmatpush.msra.mxu1 %v2003_v19  ;;  %v2075_v43 = vld [vmem:[#allocation7 + $0x20] sm:$0xff]  ;;  %2726 = vst [vmem:[#allocation21_spill] sm:$0xff] %v2077_v44  ;;  %v2087_v47 = vld [vmem:[#allocation7 + $0x10] sm:$0xff]  ;;  %v2089_v48 = vld [vmem:[#allocation7 + $0x18] sm:$0xff] }
  0x55   : > { %465 = vmatpush.msra.mxu3 %v2037_v30  ;;  %446 = vmatpush.msra.mxu2 %v2047_v33  ;;  %2725 = vst [vmem:[#allocation20_spill] sm:$0xff] %v2075_v43  ;;  %v2095_v49 = vld [vmem:[#allocation8 + $0x30] sm:$0xff]  ;;  %v2099_v51 = vld [vmem:[#allocation7] sm:$0xff]  ;;  %v2101_v52 = vld [vmem:[#allocation7 + $0x8] sm:$0xff] }
  0x56   : > { %407 = vmatpush.msra.mxu0 %v2015_v23  ;;  %427 = vmatpush.msra.mxu1 %v2017_v24  ;;  %2727 = vst [vmem:[#allocation22_spill] sm:$0xff] %v2087_v47  ;;  %v2097_v50 = vld [vmem:[#allocation8 + $0xb0] sm:$0xff]  ;;  %v396_v53 = vld [vmem:[#allocation11] sm:$0xff]  ;;  %v2111_v54 = vld [vmem:[#allocation8 + $0x28] sm:$0xff] }
  0x57   : > { %466 = vmatpush.msra.mxu3 %v2049_v34  ;;  %447 = vmatpush.msra.mxu2 %v2059_v37  ;;  %2728 = vst [vmem:[#allocation23_spill] sm:$0xff] %v2089_v48  ;;  %v2113_v55 = vld [vmem:[#allocation8 + $0xa8] sm:$0xff]  ;;  %v2117_v56 = vld [vmem:[#allocation8 + $0x20] sm:$0xff]  ;;  %v2125_v58 = vld [vmem:[#allocation8 + $0x18] sm:$0xff] }
  0x58   : > { %408 = vmatpush.msra.mxu0 %v2027_v27  ;;  %428 = vmatpush.msra.mxu1 %v2029_v28  ;;  %2729 = vst [vmem:[#allocation24_spill] sm:$0xff] %v2099_v51  ;;  %v2119_v57 = vld [vmem:[#allocation8 + $0xa0] sm:$0xff]  ;;  %v2127_v59 = vld [vmem:[#allocation8 + $0x98] sm:$0xff]  ;;  %v2133_v60 = vld [vmem:[#allocation8 + $0x10] sm:$0xff] }
  0x59   : > { %467 = vmatpush.msra.mxu3 %v2061_v38  ;;  %448 = vmatpush.msra.mxu2 %v2071_v41  ;;  %2730 = vst [vmem:[#allocation25_spill] sm:$0xff] %v2101_v52  ;;  %v2196_v61 = vld [vmem:[#allocation8 + $0x8] sm:$0xff]  ;;  %v2198_v62 = vld [vmem:[#allocation8 + $0x90] sm:$0xff]  ;;  %v2202_v63 = vld [vmem:[#allocation8] sm:$0xff] }
  0x5a   : > { %409 = vmatpush.msra.mxu0 %v2039_v31  ;;  %429 = vmatpush.msra.mxu1 %v2041_v32  ;;  %2731 = vst [vmem:[#allocation26_spill] sm:$0xff] %v2133_v60  ;;  %v2204_v0 = vld [vmem:[#allocation8 + $0x88] sm:$0xff] }
  0x5b   : > { %468 = vmatpush.msra.mxu3 %v2073_v42  ;;  %449 = vmatpush.msra.mxu2 %v2083_v45  ;;  %2732 = vst [vmem:[#allocation27_spill] sm:$0xff] %v2196_v61 }
  0x5c   : > { %410 = vmatpush.msra.mxu0 %v2051_v35  ;;  %430 = vmatpush.msra.mxu1 %v2053_v36  ;;  %2733 = vst [vmem:[#allocation28_spill] sm:$0xff] %v2198_v62 }
  0x5d   : > { %469 = vmatpush.msra.mxu3 %v2085_v46  ;;  %450 = vmatpush.msra.mxu2 %v2095_v49  ;;  %2734 = vst [vmem:[#allocation29_spill] sm:$0xff] %v2202_v63 }
  0x5e   : > { %411 = vmatpush.msra.mxu0 %v2063_v39  ;;  %431 = vmatpush.msra.mxu1 %v2065_v40 }
  0x5f   : > { %470 = vmatpush.msra.mxu3 %v2097_v50  ;;  %451 = vmatpush.msra.mxu2 %v2111_v54 }
  0x60   : > { %412 = vmatpush.msra.mxu0 %v2075_v43  ;;  %432 = vmatpush.msra.mxu1 %v2077_v44 }
  0x61   : > { %471 = vmatpush.msra.mxu3 %v2113_v55  ;;  %452 = vmatpush.msra.mxu2 %v2117_v56 }
  0x62   : > { %413 = vmatpush.msra.mxu0 %v2087_v47  ;;  %433 = vmatpush.msra.mxu1 %v2089_v48 }
  0x63   : > { %472 = vmatpush.msra.mxu3 %v2119_v57  ;;  %453 = vmatpush.msra.mxu2 %v2125_v58 }
  0x64   : > { %414 = vmatpush.msra.mxu0 %v2099_v51  ;;  %434 = vmatpush.msra.mxu1 %v2101_v52 }
  0x65   : > { %415 = vmatmul.f32.vlgmr.msra.gmra.mxu0 %v396_v53  ;;  %435 = vmatmul.f32.vlgmr.msra.gmra.mxu1 %v396_v53  ;;  %v2209_v53 = vld [vmem:[#allocation8 + $0x80] sm:$0xff] }
  0x66   : > { %495 = vmatpush.msrb.mxu0 %v1955_v1  ;;  %515 = vmatpush.msrb.mxu1 %v1959_v3 }
  0x67   : > { %473 = vmatpush.msra.mxu3 %v2127_v59  ;;  %454 = vmatpush.msra.mxu2 %v2133_v60 }
  0x68   : > { %496 = vmatpush.msrb.mxu0 %v1957_v2  ;;  %516 = vmatpush.msrb.mxu1 %v1963_v4 }
  0x69   : > { %455 = vmatpush.msra.mxu2 %v2196_v61  ;;  %474 = vmatpush.msra.mxu3 %v2198_v62 }
  0x6a   : > { %497 = vmatpush.msrb.mxu0 %v1965_v5  ;;  %517 = vmatpush.msrb.mxu1 %v1967_v6 }
  0x6b   : > { %456 = vmatpush.msra.mxu2 %v2202_v63  ;;  %475 = vmatpush.msra.mxu3 %v2204_v0 }
  0x6c   : > { %498 = vmatpush.msrb.mxu0 %v1971_v7  ;;  %518 = vmatpush.msrb.mxu1 %v1973_v8 }
  0x6d   : > { %537 = vmatpush.msrb.mxu2 %v1995_v15  ;;  %476 = vmatpush.msra.mxu3 %v2209_v53 }
  0x6e   : > { %499 = vmatpush.msrb.mxu0 %v1977_v9  ;;  %519 = vmatpush.msrb.mxu1 %v1979_v10 }
  0x6f   : > { %538 = vmatpush.msrb.mxu2 %v1997_v16  ;;  %557 = vmatpush.msrb.mxu3 %v1999_v17 }
  0x70   : > { %500 = vmatpush.msrb.mxu0 %v1983_v11  ;;  %520 = vmatpush.msrb.mxu1 %v1985_v12 }
  0x71   : > { %539 = vmatpush.msrb.mxu2 %v2011_v21  ;;  %558 = vmatpush.msrb.mxu3 %v2007_v20 }
  0x72   : > { %501 = vmatpush.msrb.mxu0 %v1989_v13  ;;  %521 = vmatpush.msrb.mxu1 %v1991_v14 }
  0x73   : > { %540 = vmatpush.msrb.mxu2 %v2023_v25  ;;  %559 = vmatpush.msrb.mxu3 %v2013_v22 }
  0x74   : > { %502 = vmatpush.msrb.mxu0 %v2001_v18  ;;  %522 = vmatpush.msrb.mxu1 %v2003_v19 }
  0x75   : > { %541 = vmatpush.msrb.mxu2 %v2035_v29  ;;  %560 = vmatpush.msrb.mxu3 %v2025_v26 }
  0x76   : > { %503 = vmatpush.msrb.mxu0 %v2015_v23  ;;  %523 = vmatpush.msrb.mxu1 %v2017_v24 }
  0x77   : > { %542 = vmatpush.msrb.mxu2 %v2047_v33  ;;  %561 = vmatpush.msrb.mxu3 %v2037_v30 }
  0x78   : > { %504 = vmatpush.msrb.mxu0 %v2027_v27  ;;  %524 = vmatpush.msrb.mxu1 %v2029_v28 }
  0x79   : > { %543 = vmatpush.msrb.mxu2 %v2059_v37  ;;  %562 = vmatpush.msrb.mxu3 %v2049_v34 }
  0x7a   : > { %505 = vmatpush.msrb.mxu0 %v2039_v31  ;;  %525 = vmatpush.msrb.mxu1 %v2041_v32 }
  0x7b   : > { %544 = vmatpush.msrb.mxu2 %v2071_v41  ;;  %563 = vmatpush.msrb.mxu3 %v2061_v38 }
  0x7c   : > { %506 = vmatpush.msrb.mxu0 %v2051_v35  ;;  %526 = vmatpush.msrb.mxu1 %v2053_v36 }
  0x7d   : > { %545 = vmatpush.msrb.mxu2 %v2083_v45  ;;  %564 = vmatpush.msrb.mxu3 %v2073_v42 }
  0x7e   : > { %507 = vmatpush.msrb.mxu0 %v2063_v39  ;;  %527 = vmatpush.msrb.mxu1 %v2065_v40 }
  0x7f   : > { %546 = vmatpush.msrb.mxu2 %v2095_v49  ;;  %565 = vmatpush.msrb.mxu3 %v2085_v46 }
  0x80   : > { %508 = vmatpush.msrb.mxu0 %v2075_v43  ;;  %528 = vmatpush.msrb.mxu1 %v2077_v44 }
  0x81   : > { %547 = vmatpush.msrb.mxu2 %v2111_v54  ;;  %566 = vmatpush.msrb.mxu3 %v2097_v50 }
  0x82   : > { %509 = vmatpush.msrb.mxu0 %v2087_v47  ;;  %529 = vmatpush.msrb.mxu1 %v2089_v48 }
  0x83   : > { %548 = vmatpush.msrb.mxu2 %v2117_v56  ;;  %567 = vmatpush.msrb.mxu3 %v2113_v55 }
  0x84   : > { %510 = vmatpush.msrb.mxu0 %v2099_v51  ;;  %530 = vmatpush.msrb.mxu1 %v2101_v52 }
  0x85   : > { %549 = vmatpush.msrb.mxu2 %v2125_v58  ;;  %568 = vmatpush.msrb.mxu3 %v2119_v57 }
  0x86   : > { %592 = vmatpush.msra.mxu0 %v1955_v1  ;;  %612 = vmatpush.msra.mxu1 %v1959_v3 }
  0x87   : > { %550 = vmatpush.msrb.mxu2 %v2133_v60  ;;  %569 = vmatpush.msrb.mxu3 %v2127_v59 }
  0x88   : > { %593 = vmatpush.msra.mxu0 %v1957_v2  ;;  %613 = vmatpush.msra.mxu1 %v1963_v4 }
  0x89   : > { %551 = vmatpush.msrb.mxu2 %v2196_v61  ;;  %570 = vmatpush.msrb.mxu3 %v2198_v62 }
  0x8a   : > { %594 = vmatpush.msra.mxu0 %v1965_v5  ;;  %614 = vmatpush.msra.mxu1 %v1967_v6 }
  0x8b   : > { %552 = vmatpush.msrb.mxu2 %v2202_v63  ;;  %571 = vmatpush.msrb.mxu3 %v2204_v0 }
  0x8c   : > { %595 = vmatpush.msra.mxu0 %v1971_v7  ;;  %615 = vmatpush.msra.mxu1 %v1973_v8 }
  0x8d   : > { %572 = vmatpush.msrb.mxu3 %v2209_v53 }
  0x8e   : > { %596 = vmatpush.msra.mxu0 %v1977_v9  ;;  %616 = vmatpush.msra.mxu1 %v1979_v10 }
  0x90   : > { %597 = vmatpush.msra.mxu0 %v1983_v11  ;;  %617 = vmatpush.msra.mxu1 %v1985_v12 }
  0x92   : > { %598 = vmatpush.msra.mxu0 %v1989_v13  ;;  %618 = vmatpush.msra.mxu1 %v1991_v14 }
  0x94   : > { %599 = vmatpush.msra.mxu0 %v2001_v18  ;;  %619 = vmatpush.msra.mxu1 %v2003_v19 }
  0x96   : > { %600 = vmatpush.msra.mxu0 %v2015_v23  ;;  %620 = vmatpush.msra.mxu1 %v2017_v24 }
  0x98   : > { %601 = vmatpush.msra.mxu0 %v2027_v27  ;;  %621 = vmatpush.msra.mxu1 %v2029_v28 }
  0x9a   : > { %602 = vmatpush.msra.mxu0 %v2039_v31  ;;  %622 = vmatpush.msra.mxu1 %v2041_v32 }
  0x9c   : > { %603 = vmatpush.msra.mxu0 %v2051_v35  ;;  %623 = vmatpush.msra.mxu1 %v2053_v36 }
  0x9e   : > { %604 = vmatpush.msra.mxu0 %v2063_v39  ;;  %624 = vmatpush.msra.mxu1 %v2065_v40 }
  0xa0   : > { %605 = vmatpush.msra.mxu0 %v2075_v43  ;;  %625 = vmatpush.msra.mxu1 %v2077_v44 }
  0xa2   : > { %606 = vmatpush.msra.mxu0 %v2087_v47  ;;  %626 = vmatpush.msra.mxu1 %v2089_v48 }
  0xa4   : > { %607 = vmatpush.msra.mxu0 %v2099_v51  ;;  %627 = vmatpush.msra.mxu1 %v2101_v52  ;;  %v397_v52 = vld [vmem:[%s1936_s20] sm:$0xff]  ;;  %v398_v51 = vld [vmem:[%s1936_s20 + $0x8] sm:$0xff] }
  0xe2   : > { %v416_v48 = vpop.f32.mrf.mxu0  ;;  %v436_v47 = vpop.f32.mrf.mxu1 }
  0xe3   : > { %v439_v44 = vadd.f32 %v416_v48, %v397_v52  ;;  %v440_v43 = vadd.f32 %v436_v47, %v398_v51  ;;  %v2737_v47 = vld [vmem:[#allocation22_spill] sm:$0xff]  ;;  %v2738_v48 = vld [vmem:[#allocation23_spill] sm:$0xff]  ;;  %v2739_v51 = vld [vmem:[#allocation24_spill] sm:$0xff] }
  0xe4   : > { %v2740_v52 = vld [vmem:[#allocation25_spill] sm:$0xff] }
  0xe5   : > { %457 = vmatmul.f32.vlgmr.msra.gmra.mxu2 %v439_v44  ;;  %511 = vmatmul.f32.vlgmr.msrb.gmra.mxu0 %v439_v44 }
  0xe6   : > { %531 = vmatmul.f32.vlgmr.msrb.gmra.mxu1 %v439_v44  ;;  %477 = vmatmul.f32.vlgmr.msra.gmra.mxu3 %v440_v43  ;;  %v2735_v43 = vld [vmem:[#allocation20_spill] sm:$0xff]  ;;  %v2736_v44 = vld [vmem:[#allocation21_spill] sm:$0xff] }
  0xe7   : > { %634 = vmatpush.msra.mxu2 %v1995_v15  ;;  %654 = vmatpush.msra.mxu3 %v1999_v17 }
  0xe8   : > { %689 = vmatpush.msrb.mxu0 %v1955_v1  ;;  %709 = vmatpush.msrb.mxu1 %v1959_v3 }
  0xe9   : > { %635 = vmatpush.msra.mxu2 %v1997_v16  ;;  %655 = vmatpush.msra.mxu3 %v2007_v20 }
  0xea   : > { %690 = vmatpush.msrb.mxu0 %v1957_v2  ;;  %710 = vmatpush.msrb.mxu1 %v1963_v4 }
  0xeb   : > { %636 = vmatpush.msra.mxu2 %v2011_v21  ;;  %656 = vmatpush.msra.mxu3 %v2013_v22 }
  0xec   : > { %691 = vmatpush.msrb.mxu0 %v1965_v5  ;;  %711 = vmatpush.msrb.mxu1 %v1967_v6 }
  0xed   : > { %637 = vmatpush.msra.mxu2 %v2023_v25  ;;  %657 = vmatpush.msra.mxu3 %v2025_v26 }
  0xee   : > { %692 = vmatpush.msrb.mxu0 %v1971_v7  ;;  %712 = vmatpush.msrb.mxu1 %v1973_v8 }
  0xef   : > { %638 = vmatpush.msra.mxu2 %v2035_v29  ;;  %658 = vmatpush.msra.mxu3 %v2037_v30 }
  0xf0   : > { %693 = vmatpush.msrb.mxu0 %v1977_v9  ;;  %713 = vmatpush.msrb.mxu1 %v1979_v10 }
  0xf1   : > { %639 = vmatpush.msra.mxu2 %v2047_v33  ;;  %659 = vmatpush.msra.mxu3 %v2049_v34 }
  0xf2   : > { %694 = vmatpush.msrb.mxu0 %v1983_v11  ;;  %714 = vmatpush.msrb.mxu1 %v1985_v12 }
  0xf3   : > { %640 = vmatpush.msra.mxu2 %v2059_v37  ;;  %660 = vmatpush.msra.mxu3 %v2061_v38 }
  0xf4   : > { %695 = vmatpush.msrb.mxu0 %v1989_v13  ;;  %715 = vmatpush.msrb.mxu1 %v1991_v14 }
  0xf5   : > { %641 = vmatpush.msra.mxu2 %v2071_v41  ;;  %661 = vmatpush.msra.mxu3 %v2073_v42 }
  0xf6   : > { %696 = vmatpush.msrb.mxu0 %v2001_v18  ;;  %716 = vmatpush.msrb.mxu1 %v2003_v19 }
  0xf7   : > { %642 = vmatpush.msra.mxu2 %v2083_v45  ;;  %662 = vmatpush.msra.mxu3 %v2085_v46 }
  0xf8   : > { %697 = vmatpush.msrb.mxu0 %v2015_v23  ;;  %717 = vmatpush.msrb.mxu1 %v2017_v24 }
  0xf9   : > { %643 = vmatpush.msra.mxu2 %v2095_v49  ;;  %663 = vmatpush.msra.mxu3 %v2097_v50 }
  0xfa   : > { %698 = vmatpush.msrb.mxu0 %v2027_v27  ;;  %718 = vmatpush.msrb.mxu1 %v2029_v28 }
  0xfb   : > { %644 = vmatpush.msra.mxu2 %v2111_v54  ;;  %664 = vmatpush.msra.mxu3 %v2113_v55 }
  0xfc   : > { %699 = vmatpush.msrb.mxu0 %v2039_v31  ;;  %719 = vmatpush.msrb.mxu1 %v2041_v32 }
  0xfd   : > { %645 = vmatpush.msra.mxu2 %v2117_v56  ;;  %665 = vmatpush.msra.mxu3 %v2119_v57 }
  0xfe   : > { %700 = vmatpush.msrb.mxu0 %v2051_v35  ;;  %720 = vmatpush.msrb.mxu1 %v2053_v36 }
  0xff   : > { %646 = vmatpush.msra.mxu2 %v2125_v58  ;;  %666 = vmatpush.msra.mxu3 %v2127_v59 }
 0x100   : > { %701 = vmatpush.msrb.mxu0 %v2063_v39  ;;  %721 = vmatpush.msrb.mxu1 %v2065_v40 }
 0x101   : > { %647 = vmatpush.msra.mxu2 %v2133_v60  ;;  %667 = vmatpush.msra.mxu3 %v2198_v62  ;;  %v1331_v62 = vld [vmem:[%s1936_s20 + $0x10] sm:$0xff] }
 0x102   : > { %702 = vmatpush.msrb.mxu0 %v2735_v43  ;;  %722 = vmatpush.msrb.mxu1 %v2736_v44  ;;  %v1332_v43 = vld [vmem:[%s1936_s20 + $0x18] sm:$0xff] }
 0x103   : > { %648 = vmatpush.msra.mxu2 %v2196_v61  ;;  %668 = vmatpush.msra.mxu3 %v2204_v0 }
 0x104   : > { %703 = vmatpush.msrb.mxu0 %v2737_v47  ;;  %723 = vmatpush.msrb.mxu1 %v2738_v48  ;;  %v2314_v48 = vld [vmem:[%s2682_s4] ss:$0 sm:$0xff] }
 0x105   : > { %649 = vmatpush.msra.mxu2 %v2202_v63  ;;  %669 = vmatpush.msra.mxu3 %v2209_v53 }
 0x106   : > { %704 = vmatpush.msrb.mxu0 %v2739_v51  ;;  %724 = vmatpush.msrb.mxu1 %v2740_v52 }
 0x162   : > { %v512_v60 = vpop.f32.mrf.mxu0 }
 0x163   : > { %v535_v44 = vadd.f32 %v1331_v62, %v512_v60  ;;  %v532_v40 = vpop.f32.mrf.mxu1  ;;  %v2742_v62 = vld [vmem:[#allocation19_spill] sm:$0xff] }
 0x164   : > { %v536_v61 = vadd.f32 %v1332_v43, %v532_v40  ;;  %v2743_v43 = vld [vmem:[#allocation26_spill] sm:$0xff] }
 0x165   : > { %553 = vmatmul.f32.vlgmr.msrb.gmra.mxu2 %v535_v44  ;;  %608 = vmatmul.f32.vlgmr.msra.gmra.mxu0 %v535_v44 }
 0x166   : > { %573 = vmatmul.f32.vlgmr.msrb.gmra.mxu3 %v536_v61  ;;  %628 = vmatmul.f32.vlgmr.msra.gmra.mxu1 %v535_v44  ;;  %v2744_v44 = vld [vmem:[#allocation28_spill] sm:$0xff] }
 0x167   : > { %731 = vmatpush.msrb.mxu2 %v1995_v15  ;;  %751 = vmatpush.msrb.mxu3 %v1999_v17 }
 0x168   : > { %v458_v52 = vpop.f32.mrf.mxu2  ;;  %786 = vmatpush.msra.mxu0 %v1955_v1  ;;  %806 = vmatpush.msra.mxu1 %v1959_v3 }
 0x169   : > { %v459_v40 = vadd.f32 %v2314_v48, %v458_v52  ;;  %v478_v60 = vpop.f32.mrf.mxu3  ;;  %732 = vmatpush.msrb.mxu2 %v1997_v16  ;;  %752 = vmatpush.msrb.mxu3 %v2007_v20  ;;  %v2745_v52 = vld [vmem:[#allocation20_spill] sm:$0xff] }
 0x16a   : > { %787 = vmatpush.msra.mxu0 %v1957_v2  ;;  %807 = vmatpush.msra.mxu1 %v1963_v4 }
 0x16b   : > { %v2325_v61 = vadd.f32 %v478_v60, %v459_v40  ;;  %733 = vmatpush.msrb.mxu2 %v2011_v21  ;;  %753 = vmatpush.msrb.mxu3 %v2013_v22  ;;  %v2746_v40 = vld [vmem:[#allocation21_spill] sm:$0xff]  ;;  %v2747_v60 = vld [vmem:[#allocation27_spill] sm:$0xff] }
 0x16c   : > { %788 = vmatpush.msra.mxu0 %v1965_v5  ;;  %808 = vmatpush.msra.mxu1 %v1967_v6 }
 0x16d   : > { %2741 = vst [vmem:[#allocation22_spill] sm:$0xff] %v2325_v61  ;;  %481 = vmax.xlane.f32.xlu0 %v2325_v61  ;;  %734 = vmatpush.msrb.mxu2 %v2023_v25  ;;  %v2748_v61 = vld [vmem:[#allocation23_spill] sm:$0xff] }
 0x16e   : > { %754 = vmatpush.msrb.mxu3 %v2025_v26  ;;  %789 = vmatpush.msra.mxu0 %v1971_v7 }
 0x16f   : > { %809 = vmatpush.msra.mxu1 %v1973_v8  ;;  %735 = vmatpush.msrb.mxu2 %v2035_v29 }
 0x170   : > { %755 = vmatpush.msrb.mxu3 %v2037_v30  ;;  %790 = vmatpush.msra.mxu0 %v1977_v9 }
 0x171   : > { %810 = vmatpush.msra.mxu1 %v1979_v10  ;;  %736 = vmatpush.msrb.mxu2 %v2047_v33 }
 0x172   : > { %756 = vmatpush.msrb.mxu3 %v2049_v34  ;;  %791 = vmatpush.msra.mxu0 %v1983_v11 }
 0x173   : > { %811 = vmatpush.msra.mxu1 %v1985_v12  ;;  %737 = vmatpush.msrb.mxu2 %v2059_v37 }
 0x174   : > { %757 = vmatpush.msrb.mxu3 %v2061_v38  ;;  %792 = vmatpush.msra.mxu0 %v1989_v13 }
 0x175   : > { %812 = vmatpush.msra.mxu1 %v1991_v14  ;;  %738 = vmatpush.msrb.mxu2 %v2071_v41 }
 0x176   : > { %758 = vmatpush.msrb.mxu3 %v2073_v42  ;;  %793 = vmatpush.msra.mxu0 %v2001_v18 }
 0x177   : > { %813 = vmatpush.msra.mxu1 %v2003_v19  ;;  %739 = vmatpush.msrb.mxu2 %v2083_v45 }
 0x178   : > { %759 = vmatpush.msrb.mxu3 %v2085_v46  ;;  %794 = vmatpush.msra.mxu0 %v2015_v23 }
 0x179   : > { %814 = vmatpush.msra.mxu1 %v2017_v24  ;;  %740 = vmatpush.msrb.mxu2 %v2095_v49 }
 0x17a   : > { %760 = vmatpush.msrb.mxu3 %v2097_v50  ;;  %795 = vmatpush.msra.mxu0 %v2027_v27 }
 0x17b   : > { %815 = vmatpush.msra.mxu1 %v2029_v28  ;;  %741 = vmatpush.msrb.mxu2 %v2111_v54 }
 0x17c   : > { %761 = vmatpush.msrb.mxu3 %v2113_v55  ;;  %796 = vmatpush.msra.mxu0 %v2039_v31 }
 0x17d   : > { %816 = vmatpush.msra.mxu1 %v2041_v32  ;;  %742 = vmatpush.msrb.mxu2 %v2117_v56 }
 0x17e   : > { %762 = vmatpush.msrb.mxu3 %v2119_v57  ;;  %797 = vmatpush.msra.mxu0 %v2051_v35 }
 0x17f   : > { %817 = vmatpush.msra.mxu1 %v2053_v36  ;;  %743 = vmatpush.msrb.mxu2 %v2125_v58 }
 0x180   : > { %763 = vmatpush.msrb.mxu3 %v2127_v59  ;;  %798 = vmatpush.msra.mxu0 %v2063_v39 }
 0x181   : > { %818 = vmatpush.msra.mxu1 %v2742_v62  ;;  %744 = vmatpush.msrb.mxu2 %v2743_v43  ;;  %v2749_v43 = vld [vmem:[#allocation25_spill] sm:$0xff] }
 0x182   : > { %764 = vmatpush.msrb.mxu3 %v2744_v44  ;;  %799 = vmatpush.msra.mxu0 %v2745_v52  ;;  %v1334_v44 = vld [vmem:[%s1936_s20 + $0x20] sm:$0xff]  ;;  %v1335_v52 = vld [vmem:[%s1936_s20 + $0x28] sm:$0xff] }
 0x183   : > { %819 = vmatpush.msra.mxu1 %v2746_v40  ;;  %745 = vmatpush.msrb.mxu2 %v2747_v60 }
 0x184   : > { %765 = vmatpush.msrb.mxu3 %v2204_v0  ;;  %800 = vmatpush.msra.mxu0 %v2737_v47 }
 0x185   : > { %820 = vmatpush.msra.mxu1 %v2748_v61  ;;  %746 = vmatpush.msrb.mxu2 %v2202_v63 }
 0x186   : > { %766 = vmatpush.msrb.mxu3 %v2209_v53  ;;  %801 = vmatpush.msra.mxu0 %v2739_v51 }
 0x187   : > { %821 = vmatpush.msra.mxu1 %v2749_v43 }
 0x1e2   : > { %v609_v62 = vpop.f32.mrf.mxu0 }
 0x1e3   : > { %v632_v40 = vadd.f32 %v1334_v44, %v609_v62  ;;  %v629_v39 = vpop.f32.mrf.mxu1  ;;  %v2753_v44 = vld [vmem:[#allocation26_spill] sm:$0xff] }
 0x1e4   : > { %v633_v60 = vadd.f32 %v1335_v52, %v629_v39  ;;  %v2754_v52 = vld [vmem:[#allocation28_spill] sm:$0xff] }
 0x1e5   : > { %650 = vmatmul.f32.vlgmr.msra.gmra.mxu2 %v632_v40  ;;  %705 = vmatmul.f32.vlgmr.msrb.gmra.mxu0 %v632_v40 }
 0x1e6   : > { %670 = vmatmul.f32.vlgmr.msra.gmra.mxu3 %v633_v60  ;;  %725 = vmatmul.f32.vlgmr.msrb.gmra.mxu1 %v632_v40  ;;  %v2755_v40 = vld [vmem:[#allocation20_spill] sm:$0xff]  ;;  %v2756_v60 = vld [vmem:[#allocation21_spill] sm:$0xff] }
 0x1e7   : > { %828 = vmatpush.msra.mxu2 %v1995_v15  ;;  %848 = vmatpush.msra.mxu3 %v1999_v17 }
 0x1e8   : > { %v554_v63 = vpop.f32.mrf.mxu2  ;;  %883 = vmatpush.msrb.mxu0 %v1955_v1  ;;  %903 = vmatpush.msrb.mxu1 %v1959_v3 }
 0x1e9   : > { %v555_v43 = vadd.f32 %v2314_v48, %v554_v63  ;;  %829 = vmatpush.msra.mxu2 %v1997_v16  ;;  %849 = vmatpush.msra.mxu3 %v2007_v20  ;;  %v574_v39 = vpop.f32.mrf.mxu3  ;;  %v2751_v63 = vld [vmem:[#allocation18_spill] sm:$0xff] }
 0x1ea   : > { %884 = vmatpush.msrb.mxu0 %v1957_v2  ;;  %904 = vmatpush.msrb.mxu1 %v1963_v4 }
 0x1eb   : > { %v2395_v62 = vadd.f32 %v574_v39, %v555_v43  ;;  %830 = vmatpush.msra.mxu2 %v2011_v21  ;;  %850 = vmatpush.msra.mxu3 %v2013_v22  ;;  %v2752_v43 = vld [vmem:[#allocation19_spill] sm:$0xff] }
 0x1ec   : > { %885 = vmatpush.msrb.mxu0 %v1965_v5  ;;  %905 = vmatpush.msrb.mxu1 %v1967_v6  ;;  %v2757_v39 = vld [vmem:[#allocation27_spill] sm:$0xff] }
 0x1ed   : > { %2750 = vst [vmem:[#allocation24_spill] sm:$0xff] %v2395_v62  ;;  %577 = vmax.xlane.f32.xlu0 %v2395_v62  ;;  %831 = vmatpush.msra.mxu2 %v2023_v25  ;;  %v2758_v62 = vld [vmem:[#allocation29_spill] sm:$0xff] }
 0x1ee   : > { %851 = vmatpush.msra.mxu3 %v2025_v26  ;;  %886 = vmatpush.msrb.mxu0 %v1971_v7 }
 0x1ef   : > { %906 = vmatpush.msrb.mxu1 %v1973_v8  ;;  %832 = vmatpush.msra.mxu2 %v2035_v29 }
 0x1f0   : > { %852 = vmatpush.msra.mxu3 %v2037_v30  ;;  %887 = vmatpush.msrb.mxu0 %v1977_v9 }
 0x1f1   : > { %907 = vmatpush.msrb.mxu1 %v1979_v10  ;;  %833 = vmatpush.msra.mxu2 %v2047_v33 }
 0x1f2   : > { %853 = vmatpush.msra.mxu3 %v2049_v34  ;;  %888 = vmatpush.msrb.mxu0 %v1983_v11 }
 0x1f3   : > { %908 = vmatpush.msrb.mxu1 %v1985_v12  ;;  %834 = vmatpush.msra.mxu2 %v2059_v37 }
 0x1f4   : > { %854 = vmatpush.msra.mxu3 %v2061_v38  ;;  %889 = vmatpush.msrb.mxu0 %v1989_v13 }
 0x1f5   : > { %909 = vmatpush.msrb.mxu1 %v1991_v14  ;;  %835 = vmatpush.msra.mxu2 %v2071_v41 }
 0x1f6   : > { %855 = vmatpush.msra.mxu3 %v2073_v42  ;;  %890 = vmatpush.msrb.mxu0 %v2001_v18 }
 0x1f7   : > { %910 = vmatpush.msrb.mxu1 %v2003_v19  ;;  %836 = vmatpush.msra.mxu2 %v2083_v45 }
 0x1f8   : > { %856 = vmatpush.msra.mxu3 %v2085_v46  ;;  %891 = vmatpush.msrb.mxu0 %v2015_v23 }
 0x1f9   : > { %911 = vmatpush.msrb.mxu1 %v2017_v24  ;;  %837 = vmatpush.msra.mxu2 %v2095_v49 }
 0x1fa   : > { %857 = vmatpush.msra.mxu3 %v2097_v50  ;;  %892 = vmatpush.msrb.mxu0 %v2027_v27 }
 0x1fb   : > { %912 = vmatpush.msrb.mxu1 %v2029_v28  ;;  %838 = vmatpush.msra.mxu2 %v2111_v54 }
 0x1fc   : > { %858 = vmatpush.msra.mxu3 %v2113_v55  ;;  %893 = vmatpush.msrb.mxu0 %v2039_v31 }
 0x1fd   : > { %913 = vmatpush.msrb.mxu1 %v2041_v32  ;;  %839 = vmatpush.msra.mxu2 %v2117_v56 }
 0x1fe   : > { %859 = vmatpush.msra.mxu3 %v2119_v57  ;;  %894 = vmatpush.msrb.mxu0 %v2051_v35 }
 0x1ff   : > { %914 = vmatpush.msrb.mxu1 %v2053_v36  ;;  %840 = vmatpush.msra.mxu2 %v2125_v58 }
 0x200   : > { %860 = vmatpush.msra.mxu3 %v2127_v59  ;;  %895 = vmatpush.msrb.mxu0 %v2751_v63 }
 0x201   : > { %915 = vmatpush.msrb.mxu1 %v2752_v43  ;;  %841 = vmatpush.msra.mxu2 %v2753_v44  ;;  %v2759_v44 = vld [vmem:[#allocation25_spill] sm:$0xff] }
 0x202   : > { %861 = vmatpush.msra.mxu3 %v2754_v52  ;;  %896 = vmatpush.msrb.mxu0 %v2755_v40  ;;  %v1337_v52 = vld [vmem:[%s1936_s20 + $0x30] sm:$0xff]  ;;  %v1338_v40 = vld [vmem:[%s1936_s20 + $0x38] sm:$0xff] }
 0x203   : > { %916 = vmatpush.msrb.mxu1 %v2756_v60  ;;  %842 = vmatpush.msra.mxu2 %v2757_v39 }
 0x204   : > { %862 = vmatpush.msra.mxu3 %v2204_v0  ;;  %897 = vmatpush.msrb.mxu0 %v2737_v47 }
 0x205   : > { %917 = vmatpush.msrb.mxu1 %v2748_v61  ;;  %843 = vmatpush.msra.mxu2 %v2758_v62 }
 0x206   : > { %863 = vmatpush.msra.mxu3 %v2209_v53  ;;  %898 = vmatpush.msrb.mxu0 %v2739_v51 }
 0x207   : > { %918 = vmatpush.msrb.mxu1 %v2759_v44 }
 0x262   : > { %v706_v43 = vpop.f32.mrf.mxu0 }
 0x263   : > { %v729_v60 = vadd.f32 %v1337_v52, %v706_v43  ;;  %v726_v63 = vpop.f32.mrf.mxu1  ;;  %v1507_v52 = vld [vmem:[#allocation7 + $0xa0] sm:$0xff] }
 0x264   : > { %v730_v39 = vadd.f32 %v1338_v40, %v726_v63  ;;  %v1508_v40 = vld [vmem:[#allocation7 + $0xa8] sm:$0xff] }
 0x265   : > { %747 = vmatmul.f32.vlgmr.msrb.gmra.mxu2 %v729_v60  ;;  %802 = vmatmul.f32.vlgmr.msra.gmra.mxu0 %v729_v60 }
 0x266   : > { %767 = vmatmul.f32.vlgmr.msrb.gmra.mxu3 %v730_v39  ;;  %822 = vmatmul.f32.vlgmr.msra.gmra.mxu1 %v729_v60  ;;  %v1509_v60 = vld [vmem:[#allocation7 + $0x90] sm:$0xff]  ;;  %v1510_v39 = vld [vmem:[#allocation7 + $0x98] sm:$0xff] }
 0x267   : > { %925 = vmatpush.msrb.mxu2 %v1995_v15  ;;  %945 = vmatpush.msrb.mxu3 %v1999_v17  ;;  %v2529_v17 = vld [vmem:[#allocation8 + $0xf8] sm:$0xff] }
 0x268   : > { %v651_v62 = vpop.f32.mrf.mxu2  ;;  %980 = vmatpush.msra.mxu0 %v1955_v1  ;;  %1000 = vmatpush.msra.mxu1 %v1959_v3  ;;  %v2760_v1 = vld [vmem:[#allocation18_spill] sm:$0xff] }
 0x269   : > { %v652_v44 = vadd.f32 %v2314_v48, %v651_v62  ;;  %926 = vmatpush.msrb.mxu2 %v1997_v16  ;;  %946 = vmatpush.msrb.mxu3 %v2007_v20  ;;  %v671_v63 = vpop.f32.mrf.mxu3  ;;  %v2762_v3 = vld [vmem:[#allocation26_spill] sm:$0xff]  ;;  %v2526_v16 = vld [vmem:[#allocation8 + $0x78] sm:$0xff]  ;;  %v2560_v62 = vld [vmem:[#allocation8 + $0x50] sm:$0xff] }
 0x26a   : > { %981 = vmatpush.msra.mxu0 %v1957_v2  ;;  %1001 = vmatpush.msra.mxu1 %v1963_v4  ;;  %v2761_v2 = vld [vmem:[#allocation19_spill] sm:$0xff]  ;;  %v2763_v4 = vld [vmem:[#allocation28_spill] sm:$0xff] }
 0x26b   : > { %v2465_v43 = vadd.f32 %v671_v63, %v652_v44  ;;  %927 = vmatpush.msrb.mxu2 %v2011_v21  ;;  %947 = vmatpush.msrb.mxu3 %v2013_v22  ;;  %v1488_v20 = vld [vmem:[#allocation7 + $0xf8] sm:$0xff]  ;;  %v2533_v22 = vld [vmem:[#allocation8 + $0x70] sm:$0xff]  ;;  %v1511_v63 = vld [vmem:[#allocation7 + $0x80] sm:$0xff] }
 0x26c   : > { %982 = vmatpush.msra.mxu0 %v1965_v5  ;;  %1002 = vmatpush.msra.mxu1 %v1967_v6  ;;  %v2764_v5 = vld [vmem:[#allocation20_spill] sm:$0xff]  ;;  %v2765_v6 = vld [vmem:[#allocation21_spill] sm:$0xff]  ;;  %v2563_v44 = vld [vmem:[#allocation8 + $0xd0] sm:$0xff] }
 0x26d   : > { %674 = vmax.xlane.f32.xlu1 %v2465_v43  ;;  %928 = vmatpush.msrb.mxu2 %v2023_v25  ;;  %v1491_v25 = vld [vmem:[#allocation7 + $0xe0] sm:$0xff] }
 0x26e   : > { %948 = vmatpush.msrb.mxu3 %v2025_v26  ;;  %983 = vmatpush.msra.mxu0 %v1971_v7  ;;  %v2766_v7 = vld [vmem:[#allocation27_spill] sm:$0xff]  ;;  %v1492_v26 = vld [vmem:[#allocation7 + $0xe8] sm:$0xff] }
 0x26f   : > { %1003 = vmatpush.msra.mxu1 %v1973_v8  ;;  %929 = vmatpush.msrb.mxu2 %v2035_v29  ;;  %v2767_v8 = vld [vmem:[#allocation29_spill] sm:$0xff]  ;;  %v2544_v29 = vld [vmem:[#allocation8 + $0xe8] sm:$0xff] }
 0x270   : > { %949 = vmatpush.msrb.mxu3 %v2037_v30  ;;  %984 = vmatpush.msra.mxu0 %v1977_v9  ;;  %v2768_v9 = vld [vmem:[#allocation25_spill] sm:$0xff]  ;;  %v1495_v30 = vld [vmem:[#allocation7 + $0xd0] sm:$0xff] }
 0x271   : > { %1004 = vmatpush.msra.mxu1 %v1979_v10  ;;  %930 = vmatpush.msrb.mxu2 %v2047_v33  ;;  %v1340_v10 = vld [vmem:[%s1936_s20 + $0x40] sm:$0xff]  ;;  %v2551_v33 = vld [vmem:[#allocation8 + $0xe0] sm:$0xff] }
 0x272   : > { %950 = vmatpush.msrb.mxu3 %v2049_v34  ;;  %985 = vmatpush.msra.mxu0 %v1983_v11  ;;  %v1341_v11 = vld [vmem:[%s1936_s20 + $0x48] sm:$0xff] }
 0x273   : > { %1005 = vmatpush.msra.mxu1 %v1985_v12  ;;  %931 = vmatpush.msrb.mxu2 %v2059_v37  ;;  %v1499_v34 = vld [vmem:[#allocation7 + $0xc0] sm:$0xff] }
 0x274   : > { %951 = vmatpush.msrb.mxu3 %v2061_v38  ;;  %986 = vmatpush.msra.mxu0 %v1989_v13 }
 0x275   : > { %1006 = vmatpush.msra.mxu1 %v1991_v14  ;;  %932 = vmatpush.msrb.mxu2 %v2071_v41 }
 0x276   : > { %952 = vmatpush.msrb.mxu3 %v2073_v42  ;;  %987 = vmatpush.msra.mxu0 %v2001_v18 }
 0x277   : > { %1007 = vmatpush.msra.mxu1 %v2003_v19  ;;  %933 = vmatpush.msrb.mxu2 %v2083_v45  ;;  %v1487_v19 = vld [vmem:[#allocation7 + $0xf0] sm:$0xff] }
 0x278   : > { %953 = vmatpush.msrb.mxu3 %v2085_v46  ;;  %988 = vmatpush.msra.mxu0 %v2015_v23  ;;  %v2536_v23 = vld [vmem:[#allocation8 + $0xf0] sm:$0xff] }
 0x279   : > { %1008 = vmatpush.msra.mxu1 %v2017_v24  ;;  %934 = vmatpush.msrb.mxu2 %v2095_v49 }
 0x27a   : > { %954 = vmatpush.msrb.mxu3 %v2097_v50  ;;  %989 = vmatpush.msra.mxu0 %v2027_v27 }
 0x27b   : > { %1009 = vmatpush.msra.mxu1 %v2029_v28  ;;  %935 = vmatpush.msrb.mxu2 %v2111_v54  ;;  %v2541_v28 = vld [vmem:[#allocation8 + $0x68] sm:$0xff] }
 0x27c   : > { %955 = vmatpush.msrb.mxu3 %v2113_v55  ;;  %990 = vmatpush.msra.mxu0 %v2039_v31  ;;  %v1496_v31 = vld [vmem:[#allocation7 + $0xd8] sm:$0xff] }
 0x27d   : > { %1010 = vmatpush.msra.mxu1 %v2041_v32  ;;  %936 = vmatpush.msrb.mxu2 %v2117_v56  ;;  %v2548_v32 = vld [vmem:[#allocation8 + $0x60] sm:$0xff] }
 0x27e   : > { %956 = vmatpush.msrb.mxu3 %v2119_v57  ;;  %991 = vmatpush.msra.mxu0 %v2051_v35  ;;  %v1500_v35 = vld [vmem:[#allocation7 + $0xc8] sm:$0xff] }
 0x27f   : > { %1011 = vmatpush.msra.mxu1 %v2053_v36  ;;  %937 = vmatpush.msrb.mxu2 %v2125_v58  ;;  %v2554_v36 = vld [vmem:[#allocation8 + $0x58] sm:$0xff] }
 0x280   : > { %957 = vmatpush.msrb.mxu3 %v2127_v59  ;;  %992 = vmatpush.msra.mxu0 %v2760_v1  ;;  %v1512_v1 = vld [vmem:[#allocation7 + $0x88] sm:$0xff] }
 0x281   : > { %1012 = vmatpush.msra.mxu1 %v2761_v2  ;;  %938 = vmatpush.msrb.mxu2 %v2762_v3  ;;  %v1513_v2 = vld [vmem:[#allocation7 + $0x70] sm:$0xff] }
 0x282   : > { %958 = vmatpush.msrb.mxu3 %v2763_v4  ;;  %993 = vmatpush.msra.mxu0 %v2764_v5  ;;  %v1343_v5 = vld [vmem:[%s1936_s20 + $0x50] sm:$0xff] }
 0x283   : > { %1013 = vmatpush.msra.mxu1 %v2765_v6  ;;  %939 = vmatpush.msrb.mxu2 %v2766_v7  ;;  %v1344_v6 = vld [vmem:[%s1936_s20 + $0x58] sm:$0xff] }
 0x284   : > { %959 = vmatpush.msrb.mxu3 %v2204_v0  ;;  %994 = vmatpush.msra.mxu0 %v2737_v47  ;;  %v2557_v47 = vld [vmem:[#allocation8 + $0xd8] sm:$0xff] }
 0x285   : > { %1014 = vmatpush.msra.mxu1 %v2748_v61  ;;  %940 = vmatpush.msrb.mxu2 %v2767_v8  ;;  %v1504_v61 = vld [vmem:[#allocation7 + $0xb8] sm:$0xff] }
 0x286   : > { %960 = vmatpush.msrb.mxu3 %v2209_v53  ;;  %995 = vmatpush.msra.mxu0 %v2739_v51  ;;  %v1503_v51 = vld [vmem:[#allocation7 + $0xb0] sm:$0xff] }
 0x287   : > { %1015 = vmatpush.msra.mxu1 %v2768_v9 }
 0x2e2   : > { %v803_v12 = vpop.f32.mrf.mxu0 }
 0x2e3   : > { %v826_v13 = vadd.f32 %v1340_v10, %v803_v12  ;;  %v823_v14 = vpop.f32.mrf.mxu1 }
 0x2e4   : > { %v827_v15 = vadd.f32 %v1341_v11, %v823_v14 }
 0x2e5   : > { %844 = vmatmul.f32.vlgmr.msra.gmra.mxu2 %v826_v13  ;;  %899 = vmatmul.f32.vlgmr.msrb.gmra.mxu0 %v826_v13 }
 0x2e6   : > { %864 = vmatmul.f32.vlgmr.msra.gmra.mxu3 %v827_v15  ;;  %919 = vmatmul.f32.vlgmr.msrb.gmra.mxu1 %v826_v13 }
 0x2e7   : > { %1022 = vmatpush.msra.mxu2 %v2526_v16  ;;  %1042 = vmatpush.msra.mxu3 %v2529_v17 }
 0x2e8   : > { %v748_v18 = vpop.f32.mrf.mxu2  ;;  %1077 = vmatpush.msrb.mxu0 %v1487_v19  ;;  %1097 = vmatpush.msrb.mxu1 %v1488_v20  ;;  %v1531_v19 = vld [vmem:[#allocation8 + $0x40] sm:$0xff] }
 0x2e9   : > { %v749_v21 = vadd.f32 %v2314_v48, %v748_v18  ;;  %1023 = vmatpush.msra.mxu2 %v2533_v22  ;;  %1043 = vmatpush.msra.mxu3 %v2536_v23  ;;  %v768_v24 = vpop.f32.mrf.mxu3  ;;  %v1532_v20 = vld [vmem:[#allocation8 + $0xc0] sm:$0xff] }
 0x2ea   : > { %1078 = vmatpush.msrb.mxu0 %v1491_v25  ;;  %1098 = vmatpush.msrb.mxu1 %v1492_v26  ;;  %v1537_v25 = vld [vmem:[#allocation8 + $0x28] sm:$0xff] }
 0x2eb   : > { %v2539_v27 = vadd.f32 %v768_v24, %v749_v21  ;;  %1024 = vmatpush.msra.mxu2 %v2541_v28  ;;  %1044 = vmatpush.msra.mxu3 %v2544_v29  ;;  %v1533_v21 = vld [vmem:[#allocation8 + $0x38] sm:$0xff]  ;;  %v1536_v24 = vld [vmem:[#allocation8 + $0xb0] sm:$0xff]  ;;  %v1538_v26 = vld [vmem:[#allocation8 + $0xa8] sm:$0xff] }
 0x2ec   : > { %1079 = vmatpush.msrb.mxu0 %v1495_v30  ;;  %1099 = vmatpush.msrb.mxu1 %v1496_v31  ;;  %v1541_v30 = vld [vmem:[#allocation8 + $0x18] sm:$0xff] }
 0x2ed   : > { %771 = vmax.xlane.f32.xlu1 %v2539_v27  ;;  %1025 = vmatpush.msra.mxu2 %v2548_v32  ;;  %v1542_v31 = vld [vmem:[#allocation8 + $0x98] sm:$0xff] }
 0x2ee   : > { %1045 = vmatpush.msra.mxu3 %v2551_v33  ;;  %1080 = vmatpush.msrb.mxu0 %v1499_v34  ;;  %v1347_v34 = vld [vmem:[%s1936_s20 + $0x68] sm:$0xff] }
 0x2ef   : > { %1100 = vmatpush.msrb.mxu1 %v1500_v35  ;;  %1026 = vmatpush.msra.mxu2 %v2554_v36  ;;  %v482_v35 = vpop.xlane.xlu0 %481 }
 0x2f0   : > { %1046 = vmatpush.msra.mxu3 %v2557_v47  ;;  %1081 = vmatpush.msrb.mxu0 %v1503_v51 }
 0x2f1   : > { %1101 = vmatpush.msrb.mxu1 %v1504_v61  ;;  %1027 = vmatpush.msra.mxu2 %v2560_v62 }
 0x2f2   : > { %1047 = vmatpush.msra.mxu3 %v2563_v44  ;;  %1082 = vmatpush.msrb.mxu0 %v1507_v52 }
 0x2f3   : > { %1102 = vmatpush.msrb.mxu1 %v1508_v40  ;;  %1028 = vmatpush.msra.mxu2 %v2059_v37  ;;  %v1514_v37 = vld [vmem:[#allocation7 + $0x78] sm:$0xff] }
 0x2f4   : > { %1048 = vmatpush.msra.mxu3 %v2061_v38  ;;  %1083 = vmatpush.msrb.mxu0 %v1509_v60  ;;  %v1515_v38 = vld [vmem:[#allocation7 + $0x60] sm:$0xff] }
 0x2f5   : > { %1103 = vmatpush.msrb.mxu1 %v1510_v39  ;;  %1029 = vmatpush.msra.mxu2 %v2071_v41  ;;  %v1516_v41 = vld [vmem:[#allocation7 + $0x68] sm:$0xff] }
 0x2f6   : > { %1049 = vmatpush.msra.mxu3 %v2073_v42  ;;  %1084 = vmatpush.msrb.mxu0 %v1511_v63  ;;  %v1517_v42 = vld [vmem:[#allocation7 + $0x50] sm:$0xff] }
 0x2f7   : > { %1104 = vmatpush.msrb.mxu1 %v1512_v1  ;;  %1030 = vmatpush.msra.mxu2 %v2083_v45  ;;  %v1518_v45 = vld [vmem:[#allocation7 + $0x58] sm:$0xff] }
 0x2f8   : > { %1050 = vmatpush.msra.mxu3 %v2085_v46  ;;  %1085 = vmatpush.msrb.mxu0 %v1513_v2  ;;  %v1519_v46 = vld [vmem:[#allocation7 + $0x40] sm:$0xff] }
 0x2f9   : > { %1105 = vmatpush.msrb.mxu1 %v1514_v37  ;;  %1031 = vmatpush.msra.mxu2 %v2095_v49  ;;  %v1520_v49 = vld [vmem:[#allocation7 + $0x48] sm:$0xff] }
 0x2fa   : > { %1051 = vmatpush.msra.mxu3 %v2097_v50  ;;  %1086 = vmatpush.msrb.mxu0 %v1515_v38  ;;  %v1521_v50 = vld [vmem:[#allocation7 + $0x30] sm:$0xff]  ;;  %v1349_v38 = vld [vmem:[%s1936_s20 + $0x70] sm:$0xff] }
 0x2fb   : > { %1106 = vmatpush.msrb.mxu1 %v1516_v41  ;;  %1032 = vmatpush.msra.mxu2 %v2111_v54  ;;  %v1522_v54 = vld [vmem:[#allocation7 + $0x38] sm:$0xff]  ;;  %v1350_v41 = vld [vmem:[%s1936_s20 + $0x78] sm:$0xff] }
 0x2fc   : > { %1052 = vmatpush.msra.mxu3 %v2113_v55  ;;  %1087 = vmatpush.msrb.mxu0 %v1517_v42  ;;  %v1523_v55 = vld [vmem:[#allocation7 + $0x20] sm:$0xff] }
 0x2fd   : > { %1107 = vmatpush.msrb.mxu1 %v1518_v45  ;;  %1033 = vmatpush.msra.mxu2 %v2117_v56  ;;  %v1524_v56 = vld [vmem:[#allocation7 + $0x28] sm:$0xff]  ;;  %v578_v45 = vpop.xlane.xlu0 %577 }
 0x2fe   : > { %1053 = vmatpush.msra.mxu3 %v2119_v57  ;;  %1088 = vmatpush.msrb.mxu0 %v1519_v46  ;;  %v1525_v57 = vld [vmem:[#allocation7 + $0x10] sm:$0xff] }
 0x2ff   : > { %1108 = vmatpush.msrb.mxu1 %v1520_v49  ;;  %1034 = vmatpush.msra.mxu2 %v2125_v58  ;;  %v1526_v58 = vld [vmem:[#allocation7 + $0x18] sm:$0xff] }
 0x300   : > { %1054 = vmatpush.msra.mxu3 %v2127_v59  ;;  %1089 = vmatpush.msrb.mxu0 %v1521_v50  ;;  %v1527_v59 = vld [vmem:[#allocation7] sm:$0xff] }
 0x301   : > { %1109 = vmatpush.msrb.mxu1 %v1522_v54  ;;  %1035 = vmatpush.msra.mxu2 %v2762_v3  ;;  %v1528_v3 = vld [vmem:[#allocation7 + $0x8] sm:$0xff]  ;;  %v2770_v54 = vld [vmem:[#allocation24_spill] sm:$0xff] }
 0x302   : > { %1055 = vmatpush.msra.mxu3 %v2763_v4  ;;  %1090 = vmatpush.msrb.mxu0 %v1523_v55  ;;  %v579_v55 = vsub.f32 %v2770_v54, %v578_v45 }
 0x303   : > { %1110 = vmatpush.msrb.mxu1 %v1524_v56  ;;  %1036 = vmatpush.msra.mxu2 %v2766_v7 }
 0x304   : > { %1056 = vmatpush.msra.mxu3 %v2204_v0  ;;  %1091 = vmatpush.msrb.mxu0 %v1525_v57 }
 0x305   : > { %1111 = vmatpush.msrb.mxu1 %v1526_v58  ;;  %1037 = vmatpush.msra.mxu2 %v2767_v8  ;;  %v580_v58 = vmul.f32 1.442695, %v579_v55 }
 0x306   : > { %1057 = vmatpush.msra.mxu3 %v2209_v53  ;;  %1092 = vmatpush.msrb.mxu0 %v1527_v59 }
 0x307   : > { %1112 = vmatpush.msrb.mxu1 %v1528_v3 }
 0x362   : > { %v900_v9 = vpop.f32.mrf.mxu0 }
 0x363   : > { %v923_v10 = vadd.f32 %v1343_v5, %v900_v9  ;;  %v920_v11 = vpop.f32.mrf.mxu1 }
 0x364   : > { %v924_v12 = vadd.f32 %v1344_v6, %v920_v11 }
 0x365   : > { %941 = vmatmul.f32.vlgmr.msrb.gmra.mxu2 %v923_v10  ;;  %996 = vmatmul.f32.vlgmr.msra.gmra.mxu0 %v923_v10 }
 0x366   : > { %961 = vmatmul.f32.vlgmr.msrb.gmra.mxu3 %v924_v12  ;;  %1016 = vmatmul.f32.vlgmr.msra.gmra.mxu1 %v923_v10 }
 0x367   : > { %1119 = vmatpush.msrb.mxu2 %v2526_v16  ;;  %1139 = vmatpush.msrb.mxu3 %v2529_v17  ;;  %v1529_v16 = vld [vmem:[#allocation8 + $0x48] sm:$0xff] }
 0x368   : > { %v845_v13 = vpop.f32.mrf.mxu2  ;;  %v1530_v17 = vld [vmem:[#allocation8 + $0xc8] sm:$0xff] }
 0x369   : > { %v846_v14 = vadd.f32 %v2314_v48, %v845_v13  ;;  %1120 = vmatpush.msrb.mxu2 %v2533_v22  ;;  %1140 = vmatpush.msrb.mxu3 %v2536_v23  ;;  %v865_v15 = vpop.f32.mrf.mxu3  ;;  %v1534_v22 = vld [vmem:[#allocation8 + $0xb8] sm:$0xff]  ;;  %v1535_v23 = vld [vmem:[#allocation8 + $0x30] sm:$0xff] }
 0x36b   : > { %v2593_v18 = vadd.f32 %v865_v15, %v846_v14  ;;  %1121 = vmatpush.msrb.mxu2 %v2541_v28  ;;  %1141 = vmatpush.msrb.mxu3 %v2544_v29  ;;  %v1539_v28 = vld [vmem:[#allocation8 + $0x20] sm:$0xff] }
 0x36c   : > { %v1540_v29 = vld [vmem:[#allocation8 + $0xa0] sm:$0xff] }
 0x36d   : > { %868 = vmax.xlane.f32.xlu2 %v2593_v18  ;;  %1122 = vmatpush.msrb.mxu2 %v2548_v32  ;;  %v1543_v32 = vld [vmem:[#allocation8 + $0x10] sm:$0xff] }
 0x36e   : > { %1142 = vmatpush.msrb.mxu3 %v2551_v33  ;;  %v1346_v33 = vld [vmem:[%s1936_s20 + $0x60] sm:$0xff]  ;;  %s1185_s20 = sshll.u32 %s1951_s30, 4  ;;  %s1186_s20 = int_to_ptr.vmem [resolvable:$true] %s1185_s20 }
 0x36f   : > { %1123 = vmatpush.msrb.mxu2 %v2554_v36 }
 0x370   : > { %1143 = vmatpush.msrb.mxu3 %v2557_v47  ;;  %v2611_v47 = vpop.xlane.xlu1 %674 }
 0x371   : > { %1124 = vmatpush.msrb.mxu2 %v2560_v62 }
 0x372   : > { %1144 = vmatpush.msrb.mxu3 %v2563_v44 }
 0x373   : > { %1125 = vmatpush.msrb.mxu2 %v1529_v16 }
 0x374   : > { %1145 = vmatpush.msrb.mxu3 %v1530_v17 }
 0x375   : > { %1126 = vmatpush.msrb.mxu2 %v1531_v19 }
 0x376   : > { %1146 = vmatpush.msrb.mxu3 %v1532_v20 }
 0x377   : > { %1127 = vmatpush.msrb.mxu2 %v1533_v21 }
 0x378   : > { %1147 = vmatpush.msrb.mxu3 %v1534_v22  ;;  %v772_v52 = vpop.xlane.xlu1 %771 }
 0x379   : > { %1128 = vmatpush.msrb.mxu2 %v1535_v23  ;;  %v773_v60 = vsub.f32 %v2539_v27, %v772_v52 }
 0x37a   : > { %1148 = vmatpush.msrb.mxu3 %v1536_v24 }
 0x37b   : > { %1129 = vmatpush.msrb.mxu2 %v1537_v25  ;;  %v774_v39 = vmul.f32 1.442695, %v773_v60 }
 0x37c   : > { %1149 = vmatpush.msrb.mxu3 %v1538_v26 }
 0x37d   : > { %1130 = vmatpush.msrb.mxu2 %v1539_v28 }
 0x37e   : > { %1150 = vmatpush.msrb.mxu3 %v1540_v29 }
 0x37f   : > { %1131 = vmatpush.msrb.mxu2 %v1541_v30 }
 0x380   : > { %1151 = vmatpush.msrb.mxu3 %v1542_v31 }
 0x381   : > { %1132 = vmatpush.msrb.mxu2 %v1543_v32 }
 0x382   : > { %1152 = vmatpush.msrb.mxu3 %v2763_v4  ;;  %v2769_v4 = vld [vmem:[#allocation22_spill] sm:$0xff] }
 0x383   : > { %1133 = vmatpush.msrb.mxu2 %v2766_v7  ;;  %v483_v44 = vsub.f32 %v2769_v4, %v482_v35 }
 0x384   : > { %1153 = vmatpush.msrb.mxu3 %v2204_v0 }
 0x385   : > { %1134 = vmatpush.msrb.mxu2 %v2767_v8 }
 0x386   : > { %1154 = vmatpush.msrb.mxu3 %v2209_v53  ;;  %v484_v53 = vmul.f32 1.442695, %v483_v44 }
 0x388   : > { %1453 = vpow2.f32 %v484_v53 }
 0x389   : > { %1455 = vpow2.f32 %v774_v39 }
 0x38e   : > { %v1454_v63 = vpop.eup %1453 }
 0x38f   : > { %v1456_v1 = vpop.eup %1455 }
 0x3e0   : > { %v869_v2 = vpop.xlane.xlu2 %868 }
 0x3e1   : > { %v870_v5 = vsub.f32 %v2593_v18, %v869_v2  ;;  %v676_v18 = vsub.f32 %v2465_v43, %v2611_v47 }
 0x3e2   : > { %v997_v36 = vpop.f32.mrf.mxu0 }
 0x3e3   : > { %v1020_v51 = vadd.f32 %v1346_v33, %v997_v36  ;;  %v1017_v61 = vpop.f32.mrf.mxu1  ;;  %v871_v11 = vmul.f32 1.442695, %v870_v5  ;;  %v677_v25 = vmul.f32 1.442695, %v676_v18 }
 0x3e4   : > { %v1021_v62 = vadd.f32 %v1347_v34, %v1017_v61 }
 0x3e5   : > { %1038 = vmatmul.f32.vlgmr.msra.gmra.mxu2 %v1020_v51  ;;  %1093 = vmatmul.f32.vlgmr.msrb.gmra.mxu0 %v1020_v51 }
 0x3e6   : > { %1058 = vmatmul.f32.vlgmr.msra.gmra.mxu3 %v1021_v62  ;;  %1113 = vmatmul.f32.vlgmr.msrb.gmra.mxu1 %v1020_v51 }
 0x3e8   : > { %v942_v0 = vpop.f32.mrf.mxu2 }
 0x3e9   : > { %v943_v7 = vadd.f32 %v2314_v48, %v942_v0  ;;  %v962_v8 = vpop.f32.mrf.mxu3 }
 0x3eb   : > { %v2615_v40 = vadd.f32 %v962_v8, %v943_v7 }
 0x3ed   : > { %965 = vmax.xlane.f32.xlu2 %v2615_v40 }
 0x3f5   : > { %486 = vadd.xlane.f32.xlu2 %v1454_v63 }
 0x3fd   : > { %776 = vadd.xlane.f32.xlu2 %v1456_v1 }
 0x460   : > { %v966_v37 = vpop.xlane.xlu2 %965 }
 0x461   : > { %v967_v30 = vsub.f32 %v2615_v40, %v966_v37 }
 0x462   : > { %v1094_v42 = vpop.f32.mrf.mxu0 }
 0x463   : > { %v1117_v46 = vadd.f32 %v1349_v38, %v1094_v42  ;;  %v1114_v49 = vpop.f32.mrf.mxu1  ;;  %v968_v43 = vmul.f32 1.442695, %v967_v30 }
 0x464   : > { %v1118_v50 = vadd.f32 %v1350_v41, %v1114_v49 }
 0x465   : > { %1171 = vst [vmem:[#allocation11] sm:$0xff] %v1117_v46  ;;  %1135 = vmatmul.f32.vlgmr.msrb.gmra.mxu2 %v1117_v46 }
 0x466   : > { %1155 = vmatmul.f32.vlgmr.msrb.gmra.mxu3 %v1118_v50  ;;  %1378 = dma.vmem_to_hbm [thread:$0]  (%p2771_p1), %s1201_s12, 128, %s1203_s29, [#allocation12]  }
 0x468   : > { %v1039_v27 = vpop.f32.mrf.mxu2  ;;  %v487_v56 = vpop.xlane.xlu2 %486 }
 0x469   : > { %v1040_v57 = vadd.f32 %v2314_v48, %v1039_v27  ;;  %1457 = vlog2.f32 %v487_v56  ;;  %v1059_v59 = vpop.f32.mrf.mxu3 }
 0x46a   : > { %1459 = vpow2.f32 %v580_v58 }
 0x46b   : > { %v1060_v3 = vadd.f32 %v1059_v59, %v1040_v57 }
 0x46d   : > { %1062 = vmax.xlane.f32.xlu0 %v1060_v3 }
 0x46f   : > { %v1458_v6 = vpop.eup %1457 }
 0x470   : > { %v489_v9 = vmul.f32 0.6931472, %v1458_v6  ;;  %v777_v10 = vpop.xlane.xlu2 %776  ;;  %v1460_v13 = vpop.eup %1459 }
 0x471   : > { %1461 = vlog2.f32 %v777_v10 }
 0x472   : > { %v490_v12 = vsub.f32 %v483_v44, %v489_v9  ;;  %1463 = vpow2.f32 %v871_v11 }
 0x474   : > { %491 = vst [vmem:[%s1951_s30] sm:$0xff] %v490_v12 }
 0x475   : > { %582 = vadd.xlane.f32.xlu0 %v1460_v13 }
 0x477   : > { %v1462_v14 = vpop.eup %1461 }
 0x478   : > { %v779_v15 = vmul.f32 0.6931472, %v1462_v14  ;;  %v1464_v17 = vpop.eup %1463 }
 0x47a   : > { %v780_v16 = vsub.f32 %v773_v60, %v779_v15 }
 0x47c   : > { %1339 = vst [vmem:[%s1951_s30 + $0x18] sm:$0xff] %v780_v16 }
 0x47d   : > { %873 = vadd.xlane.f32.xlu0 %v1464_v17 }
 0x4e0   : > { %v1063_v19 = vpop.xlane.xlu0 %1062 }
 0x4e1   : > { %v1064_v20 = vsub.f32 %v1060_v3, %v1063_v19 }
 0x4e3   : > { %v1065_v21 = vmul.f32 1.442695, %v1064_v20 }
 0x4e5   : > { %1465 = vpow2.f32 %v1065_v21 }
 0x4e8   : > { %v1136_v22 = vpop.f32.mrf.mxu2  ;;  %v583_v23 = vpop.xlane.xlu0 %582 }
 0x4e9   : > { %v1137_v24 = vadd.f32 %v2314_v48, %v1136_v22  ;;  %1467 = vlog2.f32 %v583_v23  ;;  %v1156_v26 = vpop.f32.mrf.mxu3 }
 0x4ea   : > { %1469 = vpow2.f32 %v677_v25 }
 0x4eb   : > { %v1466_v28 = vpop.eup %1465  ;;  %v1157_v29 = vadd.f32 %v1156_v26, %v1137_v24 }
 0x4ec   : > { %1067 = vadd.xlane.f32.xlu2 %v1466_v28 }
 0x4ed   : > { %1159 = vmax.xlane.f32.xlu1 %v1157_v29 }
 0x4ef   : > { %v1468_v31 = vpop.eup %1467 }
 0x4f0   : > { %v585_v32 = vmul.f32 0.6931472, %v1468_v31  ;;  %v874_v33 = vpop.xlane.xlu0 %873  ;;  %v1470_v35 = vpop.eup %1469 }
 0x4f1   : > { %1471 = vlog2.f32 %v874_v33 }
 0x4f2   : > { %v586_v34 = vsub.f32 %v579_v55, %v585_v32  ;;  %1473 = vpow2.f32 %v968_v43 }
 0x4f4   : > { %1333 = vst [vmem:[%s1951_s30 + $0x8] sm:$0xff] %v586_v34 }
 0x4f5   : > { %679 = vadd.xlane.f32.xlu1 %v1470_v35 }
 0x4f7   : > { %v1472_v48 = vpop.eup %1471 }
 0x4f8   : > { %v876_v36 = vmul.f32 0.6931472, %v1472_v48  ;;  %v1474_v51 = vpop.eup %1473 }
 0x4fa   : > { %v877_v47 = vsub.f32 %v870_v5, %v876_v36 }
 0x4fc   : > { %1342 = vst [vmem:[%s1951_s30 + $0x20] sm:$0xff] %v877_v47 }
 0x4fd   : > { %970 = vadd.xlane.f32.xlu1 %v1474_v51 }
 0x55f   : > { %v1068_v61 = vpop.xlane.xlu2 %1067 }
 0x560   : > { %1475 = vlog2.f32 %v1068_v61  ;;  %v1160_v62 = vpop.xlane.xlu1 %1159 }
 0x561   : > { %v1161_v4 = vsub.f32 %v1157_v29, %v1160_v62 }
 0x563   : > { %v1162_v44 = vmul.f32 1.442695, %v1161_v4 }
 0x565   : > { %1477 = vpow2.f32 %v1162_v44 }
 0x566   : > { %v1476_v0 = vpop.eup %1475 }
 0x567   : > { %v1070_v7 = vmul.f32 0.6931472, %v1476_v0 }
 0x568   : > { %v680_v53 = vpop.xlane.xlu1 %679 }
 0x569   : > { %v1071_v8 = vsub.f32 %v1064_v20, %v1070_v7  ;;  %1479 = vlog2.f32 %v680_v53 }
 0x56b   : > { %v1478_v52 = vpop.eup %1477  ;;  %1348 = vst [vmem:[%s1951_s30 + $0x30] sm:$0xff] %v1071_v8 }
 0x56c   : > { %1164 = vadd.xlane.f32.xlu0 %v1478_v52 }
 0x56f   : > { %v1480_v40 = vpop.eup %1479 }
 0x570   : > { %v682_v60 = vmul.f32 0.6931472, %v1480_v40  ;;  %v971_v39 = vpop.xlane.xlu1 %970 }
 0x571   : > { %1481 = vlog2.f32 %v971_v39 }
 0x572   : > { %v683_v63 = vsub.f32 %v676_v18, %v682_v60 }
 0x574   : > { %1336 = vst [vmem:[%s1951_s30 + $0x10] sm:$0xff] %v683_v63 }
 0x577   : > { %v1482_v1 = vpop.eup %1481 }
 0x578   : > { %v973_v2 = vmul.f32 0.6931472, %v1482_v1 }
 0x57a   : > { %v974_v37 = vsub.f32 %v967_v30, %v973_v2 }
 0x57c   : > { %1345 = vst [vmem:[%s1951_s30 + $0x28] sm:$0xff] %v974_v37 }
 0x5df   : > { %v1165_v38 = vpop.xlane.xlu0 %1164 }
 0x5e0   : > { %1483 = vlog2.f32 %v1165_v38 }
 0x5e6   : > { %v1484_v41 = vpop.eup %1483 }
 0x5e7   : > { %v1167_v42 = vmul.f32 0.6931472, %v1484_v41 }
 0x5e9   : > { %v1168_v45 = vsub.f32 %v1161_v4, %v1167_v42 }
 0x5eb   : > { %1351 = vst [vmem:[%s1951_s30 + $0x38] sm:$0xff] %v1168_v45 }
 0x5ec   : > { %1719 = shalt.err (!%p1716_p13)
}
 0x5ed   : > { %s1780_s19 = smov 128   ;;  %s1781_s30 = smov 8  }
 0x5ee   : > { %1376 = dma.vmem_to_hbm [thread:$0]  (%p1902_p3), %s1186_s20, 1024, %s1188_s8, %s1173_s27, %s1780_s19, %s1780_s19, %s1781_s30  }
 0x5ef   : > { %p2772_p0 = pmov %p2771_p1 }
 0x5f1   : > { %1749 = dma.done.wait (%p2772_p0), [#allocation12], 128   ;;  %p2773_p5 = pmov %p2772_p0 }
 0x5f3   : > { %1751 = vsyncadd (%p2773_p5), [#allocation12], 4294967168 }
 0x5f4 PF: > { %p1409_p7 = scmp.ge.s32.totalorder %s1770_s24, 2  ;;  %s1219_s7 = sand.u32 1, %s1758_s21  }
 0x5f5   : > { %s1220_s17 = scalar_lea.sflag [#allocation4], %s1219_s7 }
 0x5f6   : > { %p1397_p2 = pnand %p1409_p7, %p1852_p6 }
 0x5f8   : > { %p1398_p1 = pneg %p1397_p2 }
 0x5fa   : > { %1753 = dma.done.wait (%p1398_p1), %s1220_s17, 1024  }
 0x5fb   : > { %1755 = vsyncadd (%p1398_p1), %s1220_s17, 4294966272  ;;  %p23_p3 = scmp.ge.s32.totalorder %s1889_s10, 6   ;;  %s2774_s21 = smov %s1762_s22 }
 0x5fc   : > { %s2775_s22 = smov %s1766_s23  ;;  %s2776_s23 = smov %s1898_s13 }
 0x5fd   : > { %s2777_s24 = smov %s1889_s10  ;;  %25 = sbr.rel (!%p23_p3) target bundleno = 8 (0x8), region = 123 }
 0x602   :  { %1226 = vsyncpa [#allocation3], 1 }
 0x603   :  { %1228 = vsyncpa [#allocation3 + $0x1], 1 }
 0x604   :  { %1229 = vsyncpa [#allocation6], 1 }
 0x605   :  { %1230 = vsyncpa [#allocation9], 1 }
 0x606   :  { %1231 = vsyncpa [#allocation4], 1 }
 0x607   :  { %1233 = vsyncpa [#allocation4 + $0x1], 1 }
 0x608   :  { %1234 = vsyncpa [#allocation12], 1 }

</bundles_post_ra>
